<compile_context>
chip_gen: v7x
topology: tpu7x:2x2x1
jax: 0.10.0
libtpu: 0.0.40
codegen_flags: <defaults>
</compile_context>

<pallas_src>
import functools

import jax
import jax.numpy as jnp
from jax.experimental import pallas as pl
from jax.experimental.pallas import tpu as pltpu


def _pick_g(W, c_in, c_out):
    """Smallest divisor of W giving >=128-lane rows for LHS (g*c_in) and output
    (g*c_out).  kron(I_g, P) weight size / redundant MXU work scale with g, so
    smaller is better; falls back to g=W for very small channel counts."""
    for g in range(1, W + 1):
        if W % g == 0 and g * c_in >= 128 and g * c_out >= 128:
            return g
    return W


def dwsep_kernel(x_ref, dww_ref, bd_ref, o_ref, lhs_ref, *, c_in, dil, g):
    """Depthwise 3x3 (dilation `dil`) + pointwise 1x1 for `bt` images.

    x_ref   : (bt, H, W*c_in)            f32 lane-dense activations
    dww_ref : (kpl, 9, 1, W*c_in)        f32 per-tap depthwise weights (W-tiled)
    bd_ref  : (kpl*g*c_in, g*c_out)      bf16 kron(I_g, P), kpl fused along rows
    o_ref   : (bt*(W//g)*H, g*c_out)     f32 output, rows ordered (image, w-chunk, h)
    lhs_ref : (bt*(W//g)*H, kpl*g*c_in)  bf16 staging buffer for the matmul LHS
    """
    bt, H, WC_in = x_ref.shape
    kpl = dww_ref.shape[0]
    W = WC_in // c_in
    n_chunks = W // g
    gc_in = g * c_in
    R = bt * H

    x = x_ref[...].reshape(R, WC_in)          # leading-dim merge only

    # Edge masks, hoisted out of the tap loop (the iotas die here).
    row = jax.lax.broadcasted_iota(jnp.int32, (R, WC_in), 0) % H
    lane = jax.lax.broadcasted_iota(jnp.int32, (R, WC_in), 1)
    row_ok_dn = row < H - dil                 # valid when reading h + dil
    row_ok_up = row >= dil                    # valid when reading h - dil
    col_ok_rt = lane < (W - dil) * c_in       # valid when reading w + dil
    col_ok_lf = lane >= dil * c_in            # valid when reading w - dil

    def shift_rows(v, dy):                    # out[h] = v[h+dy], 0 outside image
        if dy == 0:
            return v
        r = pltpu.roll(v, shift=(-dy) % R, axis=0)
        return jnp.where(row_ok_dn if dy > 0 else row_ok_up, r, 0.0)

    def shift_cols(v, dx):                    # out[w] = v[w+dx], 0 outside image
        if dx == 0:
            return v
        r = pltpu.roll(v, shift=(-dx * c_in) % WC_in, axis=1)
        return jnp.where(col_ok_rt if dx > 0 else col_ok_lf, r, 0.0)

    # Depthwise 3x3 on the VPU (f32): init from the centre tap, add the rest.
    accs = [x * dww_ref[j, 4] for j in range(kpl)]
    for ky_i, ky in enumerate((-1, 0, 1)):
        xr = shift_rows(x, ky * dil)
        for kx_i, kx in enumerate((-1, 0, 1)):
            k = ky_i * 3 + kx_i
            if k == 4:
                continue
            win = shift_cols(xr, kx * dil)
            for j in range(kpl):
                accs[j] = accs[j] + win * dww_ref[j, k]

    # Stage the matmul LHS: rows ordered (image, w-chunk, h); the kpl
    # accumulators are concatenated along the contraction axis.  All sub-block
    # writes are sublane/lane aligned, cast to bf16 for the MXU.
    for j in range(kpl):
        acc_bf = accs[j].astype(jnp.bfloat16)
        for b in range(bt):
            for a in range(n_chunks):
                r0 = (b * n_chunks + a) * H
                lhs_ref[r0:r0 + H, j * gc_in:(j + 1) * gc_in] = (
                    acc_bf[b * H:(b + 1) * H, a * gc_in:(a + 1) * gc_in])

    # Pointwise 1x1: one fused bf16 MXU matmul, f32 accumulation, lane-dense out.
    out = jnp.dot(lhs_ref[...], bd_ref[...], preferred_element_type=jnp.float32)
    o_ref[...] = out.astype(o_ref.dtype)


def prepare_weights(dw_w, pw_w, *, c_in, kpl, W, g):
    """Per-parameter-update preprocessing (cacheable; keep out of the hot path)."""
    c_out = pw_w.shape[0]
    # Depthwise taps -> (kpl, 9, 1, W*c_in): lane-dense broadcast rows.
    dwr = dw_w.reshape(c_in, kpl, 3, 3).transpose(1, 2, 3, 0).reshape(kpl, 9, c_in)
    dww = jnp.tile(dwr, (1, 1, W)).reshape(kpl, 9, 1, W * c_in).astype(jnp.float32)
    # Pointwise P_j[i, o] = pw[o, i*kpl + j] -> kron(I_g, P_j), kpl fused along
    # the contraction axis, stored bf16 for the native MXU path.
    pwj = pw_w.reshape(c_out, c_in, kpl).transpose(2, 1, 0)        # (kpl, c_in, c_out)
    eye_g = jnp.eye(g, dtype=jnp.float32)
    bd = jnp.einsum("ab,jio->jaibo", eye_g, pwj).reshape(kpl * g * c_in, g * c_out)
    return dww, bd.astype(jnp.bfloat16)


def depthwise_conv2d_forward(x_nchw, dw_w, pw_w, *, kernels_per_layer, dilation=1):
    """x_nchw: (B,C_in,H,W); dw_w: (C_in*kpl,3,3); pw_w: (C_out,C_in*kpl)."""
    B, C_in, H, W = x_nchw.shape
    kpl = kernels_per_layer
    C_out = pw_w.shape[0]
    assert dw_w.shape == (C_in * kpl, 3, 3)
    assert pw_w.shape == (C_out, C_in * kpl)
    assert 0 < dilation < min(H, W), "roll+mask halo assumes dilation < H and < W"
    WC_in = W * C_in

    g = _pick_g(W, C_in, C_out)
    n_chunks = W // g
    gc_in, gc_out = g * C_in, g * C_out

    # Batch elements folded per grid step; keep >=2 grid steps when possible so
    # v7x megacore gets both TensorCores busy.
    bt = B // 2 if (B > 2 and B % 2 == 0) else 1
    rows_per_step = bt * n_chunks * H

    # TODO(synk): cache prepare_weights() per parameter update, not per call.
    dww, bd = prepare_weights(dw_w, pw_w, c_in=C_in, kpl=kpl, W=W, g=g)

    # VMEM plan per grid step (x/out double-buffered, weights + staging counted
    # conservatively at 2x): must stay within the v5e 16 MiB default scoped limit.
    vmem_bytes = (2 * (bt * H * WC_in * 4)
                  + 2 * (rows_per_step * gc_out * 4)
                  + 2 * (dww.size * 4 + bd.size * 2)
                  + rows_per_step * kpl * gc_in * 2)
    assert vmem_bytes < 16 * 1024 * 1024, (
        f"per-step VMEM footprint {vmem_bytes / 2**20:.1f} MiB too large; "
        "reduce bt or add an H-block grid axis")

    # NCHW -> NHWC -> lane-dense (B, H, W*C_in) f32.
    x_flat = jnp.transpose(x_nchw, (0, 2, 3, 1)).reshape(B, H, WC_in)
    x_flat = x_flat.astype(jnp.float32)

    kernel = functools.partial(dwsep_kernel, c_in=C_in, dil=dilation, g=g)

    out_flat = pl.pallas_call(
        kernel,
        out_shape=jax.ShapeDtypeStruct((B * n_chunks * H, gc_out), jnp.float32),
        grid_spec=pltpu.PrefetchScalarGridSpec(
            num_scalar_prefetch=0,
            grid=(B // bt,),
            in_specs=[
                pl.BlockSpec((bt, H, WC_in), lambda b: (b, 0, 0)),
                # Grid-invariant weights: constant index maps -> DMA'd once.
                pl.BlockSpec(dww.shape, lambda b: (0, 0, 0, 0)),
                pl.BlockSpec(bd.shape, lambda b: (0, 0)),
            ],
            out_specs=pl.BlockSpec((rows_per_step, gc_out), lambda b: (b, 0)),
            scratch_shapes=[
                pltpu.VMEM((rows_per_step, kpl * gc_in), jnp.bfloat16)],
        ),
        compiler_params=pltpu.CompilerParams(
            dimension_semantics=("parallel",)),
    )(x_flat, dww, bd)

    # Rows are (image, w-chunk, h); lanes are (g, C_out)  ->  NCHW.
    out = out_flat.reshape(B, n_chunks, H, g, C_out)
    return out.transpose(0, 4, 2, 1, 3).reshape(B, C_out, H, W)


def reference(x_nchw, dw_w, pw_w, *, kernels_per_layer, dilation=1):
    """Pure-JAX (f32, HIGHEST) reference mirroring the PyTorch module."""
    B, C_in, H, W = x_nchw.shape
    kpl = kernels_per_layer
    C_out = pw_w.shape[0]
    pad = (3 - 1) * dilation // 2
    dw = jax.lax.conv_general_dilated(
        x_nchw.astype(jnp.float32), dw_w.reshape(C_in * kpl, 1, 3, 3),
        window_strides=(1, 1), padding=((pad, pad), (pad, pad)),
        rhs_dilation=(dilation, dilation),
        dimension_numbers=("NCHW", "OIHW", "NCHW"),
        feature_group_count=C_in,
        precision=jax.lax.Precision.HIGHEST)
    out = jax.lax.conv_general_dilated(
        dw, pw_w.reshape(C_out, C_in * kpl, 1, 1),
        window_strides=(1, 1), padding="VALID",
        dimension_numbers=("NCHW", "OIHW", "NCHW"),
        precision=jax.lax.Precision.HIGHEST)
    return out


if __name__ == "__main__":
    B, C_in, H, W = 2, 32, 16, 16
    kpl, C_out, dilation = 2, 32, 1      # kernels_per_layer=2, nout=32

    key = jax.random.PRNGKey(0)
    kx, kd, kp = jax.random.split(key, 3)
    x = jax.random.normal(kx, (B, C_in, H, W), jnp.float32)            # NCHW
    dw_w = 0.2 * jax.random.normal(kd, (C_in * kpl, 3, 3), jnp.float32)
    pw_w = jax.random.normal(kp, (C_out, C_in * kpl), jnp.float32) / jnp.sqrt(
        float(C_in * kpl))

    out = depthwise_conv2d_forward(x, dw_w, pw_w,
                                   kernels_per_layer=kpl, dilation=dilation)
    out = jax.block_until_ready(out)
    assert out.shape == (B, C_out, H, W)

    ref = reference(x, dw_w, pw_w, kernels_per_layer=kpl, dilation=dilation)
    max_err = jnp.max(jnp.abs(out - ref))
    if not jnp.allclose(out, ref, rtol=2e-2, atol=2e-2):
        raise AssertionError(f"mismatch vs reference: max abs err {max_err}")

    print("KERNEL_OK")
</pallas_src>

<mosaic_0001>
module attributes {stable_mosaic.version = 11 : i64} {
  func.func @dwsep_kernel(%arg0: i32, %arg1: memref<1x16x512xf32, #tpu.memory_space<vmem>>, %arg2: memref<2x9x1x512xf32, #tpu.memory_space<vmem>>, %arg3: memref<256x128xbf16, #tpu.memory_space<vmem>>, %arg4: memref<64x128xf32, #tpu.memory_space<vmem>>, %arg5: memref<64x256xbf16, #tpu.memory_space<vmem>>) attributes {dimension_semantics = [#tpu.dimension_semantics<parallel>], iteration_bounds = array<i64: 2>, scalar_prefetch = 0 : i64, scratch_operands = 1 : i64, tpu.core_type = #tpu.core_type<tc>, window_params = [{transform_indices = @transform_0, window_bounds = array<i64: 1, 16, 512>}, {pipeline_mode = #tpu.pipeline_mode<synchronous>, transform_indices = @transform_1, window_bounds = array<i64: 2, 9, 1, 512>}, {pipeline_mode = #tpu.pipeline_mode<synchronous>, transform_indices = @transform_2, window_bounds = array<i64: 256, 128>}, {transform_indices = @transform_3, window_bounds = array<i64: 64, 128>}]} {
    %c0 = arith.constant 0 : index
    %c0_0 = arith.constant 0 : index
    %c0_1 = arith.constant 0 : index
    %0 = vector.load %arg1[%c0, %c0_0, %c0_1] : memref<1x16x512xf32, #tpu.memory_space<vmem>>, vector<1x16x512xf32>
    %1 = vector.shape_cast %0 : vector<1x16x512xf32> to vector<16x512xf32>
    %2 = tpu.iota {dimensions = array<i32: 0>} : vector<16x512xi32>
    %c16_i32 = arith.constant 16 : i32
    %c0_i32 = arith.constant 0 : i32
    %3 = arith.cmpi eq, %c16_i32, %c0_i32 : i32
    %c1_i32 = arith.constant 1 : i32
    %4 = arith.select %3, %c1_i32, %c16_i32 : i32
    %5 = vector.broadcast %4 : i32 to vector<16x512xi32>
    %6 = arith.remsi %2, %5 : vector<16x512xi32>
    %c0_i32_2 = arith.constant 0 : i32
    %7 = vector.broadcast %c0_i32_2 : i32 to vector<16x512xi32>
    %8 = arith.cmpi ne, %6, %7 : vector<16x512xi32>
    %c0_i32_3 = arith.constant 0 : i32
    %9 = vector.broadcast %c0_i32_3 : i32 to vector<16x512xi32>
    %10 = arith.cmpi slt, %6, %9 : vector<16x512xi32>
    %c0_i32_4 = arith.constant 0 : i32
    %11 = arith.cmpi slt, %4, %c0_i32_4 : i32
    %12 = vector.broadcast %11 : i1 to vector<16x512xi1>
    %13 = vector.broadcast %12 : vector<16x512xi1> to vector<16x512xi1>
    %14 = arith.xori %10, %13 : vector<16x512xi1>
    %15 = arith.andi %14, %8 : vector<16x512xi1>
    %16 = vector.broadcast %4 : i32 to vector<16x512xi32>
    %17 = arith.addi %6, %16 : vector<16x512xi32>
    %18 = arith.select %15, %17, %6 : vector<16x512xi1>, vector<16x512xi32>
    %19 = tpu.iota {dimensions = array<i32: 1>} : vector<16x512xi32>
    %c15_i32 = arith.constant 15 : i32
    %20 = vector.broadcast %c15_i32 : i32 to vector<16x512xi32>
    %21 = arith.cmpi slt, %18, %20 : vector<16x512xi32>
    %c1_i32_5 = arith.constant 1 : i32
    %22 = vector.broadcast %c1_i32_5 : i32 to vector<16x512xi32>
    %23 = arith.cmpi sge, %18, %22 : vector<16x512xi32>
    %c480_i32 = arith.constant 480 : i32
    %24 = vector.broadcast %c480_i32 : i32 to vector<16x512xi32>
    %25 = arith.cmpi slt, %19, %24 : vector<16x512xi32>
    %c32_i32 = arith.constant 32 : i32
    %26 = vector.broadcast %c32_i32 : i32 to vector<16x512xi32>
    %27 = arith.cmpi sge, %19, %26 : vector<16x512xi32>
    %c0_6 = arith.constant 0 : index
    %c4 = arith.constant 4 : index
    %c0_7 = arith.constant 0 : index
    %c0_8 = arith.constant 0 : index
    %28 = vector.load %arg2[%c0_6, %c4, %c0_7, %c0_8] : memref<2x9x1x512xf32, #tpu.memory_space<vmem>>, vector<1x1x1x512xf32>
    %29 = vector.shape_cast %28 : vector<1x1x1x512xf32> to vector<1x512xf32>
    %30 = vector.broadcast %29 : vector<1x512xf32> to vector<16x512xf32>
    %31 = arith.mulf %1, %30 : vector<16x512xf32>
    %c1 = arith.constant 1 : index
    %c4_9 = arith.constant 4 : index
    %c0_10 = arith.constant 0 : index
    %c0_11 = arith.constant 0 : index
    %32 = vector.load %arg2[%c1, %c4_9, %c0_10, %c0_11] : memref<2x9x1x512xf32, #tpu.memory_space<vmem>>, vector<1x1x1x512xf32>
    %33 = vector.shape_cast %32 : vector<1x1x1x512xf32> to vector<1x512xf32>
    %34 = vector.broadcast %33 : vector<1x512xf32> to vector<16x512xf32>
    %35 = arith.mulf %1, %34 : vector<16x512xf32>
    %c1_i32_12 = arith.constant 1 : i32
    %36 = tpu.dynamic_rotate %1 by %c1_i32_12 dim 0 : vector<16x512xf32>, i32 -> vector<16x512xf32>
    %cst = arith.constant 0.000000e+00 : f32
    %37 = vector.broadcast %cst : f32 to vector<16x512xf32>
    %38 = arith.select %23, %36, %37 : vector<16x512xi1>, vector<16x512xf32>
    %c32_i32_13 = arith.constant 32 : i32
    %39 = tpu.dynamic_rotate %38 by %c32_i32_13 dim 1 : vector<16x512xf32>, i32 -> vector<16x512xf32>
    %cst_14 = arith.constant 0.000000e+00 : f32
    %40 = vector.broadcast %cst_14 : f32 to vector<16x512xf32>
    %41 = arith.select %27, %39, %40 : vector<16x512xi1>, vector<16x512xf32>
    %c0_15 = arith.constant 0 : index
    %c0_16 = arith.constant 0 : index
    %c0_17 = arith.constant 0 : index
    %c0_18 = arith.constant 0 : index
    %42 = vector.load %arg2[%c0_15, %c0_16, %c0_17, %c0_18] : memref<2x9x1x512xf32, #tpu.memory_space<vmem>>, vector<1x1x1x512xf32>
    %43 = vector.shape_cast %42 : vector<1x1x1x512xf32> to vector<1x512xf32>
    %44 = vector.broadcast %43 : vector<1x512xf32> to vector<16x512xf32>
    %45 = arith.mulf %41, %44 : vector<16x512xf32>
    %46 = arith.addf %31, %45 : vector<16x512xf32>
    %c1_19 = arith.constant 1 : index
    %c0_20 = arith.constant 0 : index
    %c0_21 = arith.constant 0 : index
    %c0_22 = arith.constant 0 : index
    %47 = vector.load %arg2[%c1_19, %c0_20, %c0_21, %c0_22] : memref<2x9x1x512xf32, #tpu.memory_space<vmem>>, vector<1x1x1x512xf32>
    %48 = vector.shape_cast %47 : vector<1x1x1x512xf32> to vector<1x512xf32>
    %49 = vector.broadcast %48 : vector<1x512xf32> to vector<16x512xf32>
    %50 = arith.mulf %41, %49 : vector<16x512xf32>
    %51 = arith.addf %35, %50 : vector<16x512xf32>
    %c0_23 = arith.constant 0 : index
    %c1_24 = arith.constant 1 : index
    %c0_25 = arith.constant 0 : index
    %c0_26 = arith.constant 0 : index
    %52 = vector.load %arg2[%c0_23, %c1_24, %c0_25, %c0_26] : memref<2x9x1x512xf32, #tpu.memory_space<vmem>>, vector<1x1x1x512xf32>
    %53 = vector.shape_cast %52 : vector<1x1x1x512xf32> to vector<1x512xf32>
    %54 = vector.broadcast %53 : vector<1x512xf32> to vector<16x512xf32>
    %55 = arith.mulf %38, %54 : vector<16x512xf32>
    %56 = arith.addf %46, %55 : vector<16x512xf32>
    %c1_27 = arith.constant 1 : index
    %c1_28 = arith.constant 1 : index
    %c0_29 = arith.constant 0 : index
    %c0_30 = arith.constant 0 : index
    %57 = vector.load %arg2[%c1_27, %c1_28, %c0_29, %c0_30] : memref<2x9x1x512xf32, #tpu.memory_space<vmem>>, vector<1x1x1x512xf32>
    %58 = vector.shape_cast %57 : vector<1x1x1x512xf32> to vector<1x512xf32>
    %59 = vector.broadcast %58 : vector<1x512xf32> to vector<16x512xf32>
    %60 = arith.mulf %38, %59 : vector<16x512xf32>
    %61 = arith.addf %51, %60 : vector<16x512xf32>
    %c480_i32_31 = arith.constant 480 : i32
    %62 = tpu.dynamic_rotate %38 by %c480_i32_31 dim 1 : vector<16x512xf32>, i32 -> vector<16x512xf32>
    %cst_32 = arith.constant 0.000000e+00 : f32
    %63 = vector.broadcast %cst_32 : f32 to vector<16x512xf32>
    %64 = arith.select %25, %62, %63 : vector<16x512xi1>, vector<16x512xf32>
    %c0_33 = arith.constant 0 : index
    %c2 = arith.constant 2 : index
    %c0_34 = arith.constant 0 : index
    %c0_35 = arith.constant 0 : index
    %65 = vector.load %arg2[%c0_33, %c2, %c0_34, %c0_35] : memref<2x9x1x512xf32, #tpu.memory_space<vmem>>, vector<1x1x1x512xf32>
    %66 = vector.shape_cast %65 : vector<1x1x1x512xf32> to vector<1x512xf32>
    %67 = vector.broadcast %66 : vector<1x512xf32> to vector<16x512xf32>
    %68 = arith.mulf %64, %67 : vector<16x512xf32>
    %69 = arith.addf %56, %68 : vector<16x512xf32>
    %c1_36 = arith.constant 1 : index
    %c2_37 = arith.constant 2 : index
    %c0_38 = arith.constant 0 : index
    %c0_39 = arith.constant 0 : index
    %70 = vector.load %arg2[%c1_36, %c2_37, %c0_38, %c0_39] : memref<2x9x1x512xf32, #tpu.memory_space<vmem>>, vector<1x1x1x512xf32>
    %71 = vector.shape_cast %70 : vector<1x1x1x512xf32> to vector<1x512xf32>
    %72 = vector.broadcast %71 : vector<1x512xf32> to vector<16x512xf32>
    %73 = arith.mulf %64, %72 : vector<16x512xf32>
    %74 = arith.addf %61, %73 : vector<16x512xf32>
    %c32_i32_40 = arith.constant 32 : i32
    %75 = tpu.dynamic_rotate %1 by %c32_i32_40 dim 1 : vector<16x512xf32>, i32 -> vector<16x512xf32>
    %cst_41 = arith.constant 0.000000e+00 : f32
    %76 = vector.broadcast %cst_41 : f32 to vector<16x512xf32>
    %77 = arith.select %27, %75, %76 : vector<16x512xi1>, vector<16x512xf32>
    %c0_42 = arith.constant 0 : index
    %c3 = arith.constant 3 : index
    %c0_43 = arith.constant 0 : index
    %c0_44 = arith.constant 0 : index
    %78 = vector.load %arg2[%c0_42, %c3, %c0_43, %c0_44] : memref<2x9x1x512xf32, #tpu.memory_space<vmem>>, vector<1x1x1x512xf32>
    %79 = vector.shape_cast %78 : vector<1x1x1x512xf32> to vector<1x512xf32>
    %80 = vector.broadcast %79 : vector<1x512xf32> to vector<16x512xf32>
    %81 = arith.mulf %77, %80 : vector<16x512xf32>
    %82 = arith.addf %69, %81 : vector<16x512xf32>
    %c1_45 = arith.constant 1 : index
    %c3_46 = arith.constant 3 : index
    %c0_47 = arith.constant 0 : index
    %c0_48 = arith.constant 0 : index
    %83 = vector.load %arg2[%c1_45, %c3_46, %c0_47, %c0_48] : memref<2x9x1x512xf32, #tpu.memory_space<vmem>>, vector<1x1x1x512xf32>
    %84 = vector.shape_cast %83 : vector<1x1x1x512xf32> to vector<1x512xf32>
    %85 = vector.broadcast %84 : vector<1x512xf32> to vector<16x512xf32>
    %86 = arith.mulf %77, %85 : vector<16x512xf32>
    %87 = arith.addf %74, %86 : vector<16x512xf32>
    %c480_i32_49 = arith.constant 480 : i32
    %88 = tpu.dynamic_rotate %1 by %c480_i32_49 dim 1 : vector<16x512xf32>, i32 -> vector<16x512xf32>
    %cst_50 = arith.constant 0.000000e+00 : f32
    %89 = vector.broadcast %cst_50 : f32 to vector<16x512xf32>
    %90 = arith.select %25, %88, %89 : vector<16x512xi1>, vector<16x512xf32>
    %c0_51 = arith.constant 0 : index
    %c5 = arith.constant 5 : index
    %c0_52 = arith.constant 0 : index
    %c0_53 = arith.constant 0 : index
    %91 = vector.load %arg2[%c0_51, %c5, %c0_52, %c0_53] : memref<2x9x1x512xf32, #tpu.memory_space<vmem>>, vector<1x1x1x512xf32>
    %92 = vector.shape_cast %91 : vector<1x1x1x512xf32> to vector<1x512xf32>
    %93 = vector.broadcast %92 : vector<1x512xf32> to vector<16x512xf32>
    %94 = arith.mulf %90, %93 : vector<16x512xf32>
    %95 = arith.addf %82, %94 : vector<16x512xf32>
    %c1_54 = arith.constant 1 : index
    %c5_55 = arith.constant 5 : index
    %c0_56 = arith.constant 0 : index
    %c0_57 = arith.constant 0 : index
    %96 = vector.load %arg2[%c1_54, %c5_55, %c0_56, %c0_57] : memref<2x9x1x512xf32, #tpu.memory_space<vmem>>, vector<1x1x1x512xf32>
    %97 = vector.shape_cast %96 : vector<1x1x1x512xf32> to vector<1x512xf32>
    %98 = vector.broadcast %97 : vector<1x512xf32> to vector<16x512xf32>
    %99 = arith.mulf %90, %98 : vector<16x512xf32>
    %100 = arith.addf %87, %99 : vector<16x512xf32>
    %c15_i32_58 = arith.constant 15 : i32
    %101 = tpu.dynamic_rotate %1 by %c15_i32_58 dim 0 : vector<16x512xf32>, i32 -> vector<16x512xf32>
    %cst_59 = arith.constant 0.000000e+00 : f32
    %102 = vector.broadcast %cst_59 : f32 to vector<16x512xf32>
    %103 = arith.select %21, %101, %102 : vector<16x512xi1>, vector<16x512xf32>
    %c32_i32_60 = arith.constant 32 : i32
    %104 = tpu.dynamic_rotate %103 by %c32_i32_60 dim 1 : vector<16x512xf32>, i32 -> vector<16x512xf32>
    %cst_61 = arith.constant 0.000000e+00 : f32
    %105 = vector.broadcast %cst_61 : f32 to vector<16x512xf32>
    %106 = arith.select %27, %104, %105 : vector<16x512xi1>, vector<16x512xf32>
    %c0_62 = arith.constant 0 : index
    %c6 = arith.constant 6 : index
    %c0_63 = arith.constant 0 : index
    %c0_64 = arith.constant 0 : index
    %107 = vector.load %arg2[%c0_62, %c6, %c0_63, %c0_64] : memref<2x9x1x512xf32, #tpu.memory_space<vmem>>, vector<1x1x1x512xf32>
    %108 = vector.shape_cast %107 : vector<1x1x1x512xf32> to vector<1x512xf32>
    %109 = vector.broadcast %108 : vector<1x512xf32> to vector<16x512xf32>
    %110 = arith.mulf %106, %109 : vector<16x512xf32>
    %111 = arith.addf %95, %110 : vector<16x512xf32>
    %c1_65 = arith.constant 1 : index
    %c6_66 = arith.constant 6 : index
    %c0_67 = arith.constant 0 : index
    %c0_68 = arith.constant 0 : index
    %112 = vector.load %arg2[%c1_65, %c6_66, %c0_67, %c0_68] : memref<2x9x1x512xf32, #tpu.memory_space<vmem>>, vector<1x1x1x512xf32>
    %113 = vector.shape_cast %112 : vector<1x1x1x512xf32> to vector<1x512xf32>
    %114 = vector.broadcast %113 : vector<1x512xf32> to vector<16x512xf32>
    %115 = arith.mulf %106, %114 : vector<16x512xf32>
    %116 = arith.addf %100, %115 : vector<16x512xf32>
    %c0_69 = arith.constant 0 : index
    %c7 = arith.constant 7 : index
    %c0_70 = arith.constant 0 : index
    %c0_71 = arith.constant 0 : index
    %117 = vector.load %arg2[%c0_69, %c7, %c0_70, %c0_71] : memref<2x9x1x512xf32, #tpu.memory_space<vmem>>, vector<1x1x1x512xf32>
    %118 = vector.shape_cast %117 : vector<1x1x1x512xf32> to vector<1x512xf32>
    %119 = vector.broadcast %118 : vector<1x512xf32> to vector<16x512xf32>
    %120 = arith.mulf %103, %119 : vector<16x512xf32>
    %121 = arith.addf %111, %120 : vector<16x512xf32>
    %c1_72 = arith.constant 1 : index
    %c7_73 = arith.constant 7 : index
    %c0_74 = arith.constant 0 : index
    %c0_75 = arith.constant 0 : index
    %122 = vector.load %arg2[%c1_72, %c7_73, %c0_74, %c0_75] : memref<2x9x1x512xf32, #tpu.memory_space<vmem>>, vector<1x1x1x512xf32>
    %123 = vector.shape_cast %122 : vector<1x1x1x512xf32> to vector<1x512xf32>
    %124 = vector.broadcast %123 : vector<1x512xf32> to vector<16x512xf32>
    %125 = arith.mulf %103, %124 : vector<16x512xf32>
    %126 = arith.addf %116, %125 : vector<16x512xf32>
    %c480_i32_76 = arith.constant 480 : i32
    %127 = tpu.dynamic_rotate %103 by %c480_i32_76 dim 1 : vector<16x512xf32>, i32 -> vector<16x512xf32>
    %cst_77 = arith.constant 0.000000e+00 : f32
    %128 = vector.broadcast %cst_77 : f32 to vector<16x512xf32>
    %129 = arith.select %25, %127, %128 : vector<16x512xi1>, vector<16x512xf32>
    %c0_78 = arith.constant 0 : index
    %c8 = arith.constant 8 : index
    %c0_79 = arith.constant 0 : index
    %c0_80 = arith.constant 0 : index
    %130 = vector.load %arg2[%c0_78, %c8, %c0_79, %c0_80] : memref<2x9x1x512xf32, #tpu.memory_space<vmem>>, vector<1x1x1x512xf32>
    %131 = vector.shape_cast %130 : vector<1x1x1x512xf32> to vector<1x512xf32>
    %132 = vector.broadcast %131 : vector<1x512xf32> to vector<16x512xf32>
    %133 = arith.mulf %129, %132 : vector<16x512xf32>
    %134 = arith.addf %121, %133 : vector<16x512xf32>
    %c1_81 = arith.constant 1 : index
    %c8_82 = arith.constant 8 : index
    %c0_83 = arith.constant 0 : index
    %c0_84 = arith.constant 0 : index
    %135 = vector.load %arg2[%c1_81, %c8_82, %c0_83, %c0_84] : memref<2x9x1x512xf32, #tpu.memory_space<vmem>>, vector<1x1x1x512xf32>
    %136 = vector.shape_cast %135 : vector<1x1x1x512xf32> to vector<1x512xf32>
    %137 = vector.broadcast %136 : vector<1x512xf32> to vector<16x512xf32>
    %138 = arith.mulf %129, %137 : vector<16x512xf32>
    %139 = arith.addf %126, %138 : vector<16x512xf32>
    %140 = arith.truncf %134 : vector<16x512xf32> to vector<16x512xbf16>
    %141 = vector.extract_strided_slice %140 {offsets = [0, 0], sizes = [16, 128], strides = [1, 1]} : vector<16x512xbf16> to vector<16x128xbf16>
    %c0_85 = arith.constant 0 : index
    %c0_86 = arith.constant 0 : index
    %142 = vector.load %arg5[%c0_85, %c0_86] : memref<64x256xbf16, #tpu.memory_space<vmem>>, vector<16x128xbf16>
    tpu.vector_store %arg5[%c0_85, %c0_86], %141 {strides = array<i32>} : memref<64x256xbf16, #tpu.memory_space<vmem>>, vector<16x128xbf16>,
    %143 = vector.extract_strided_slice %140 {offsets = [0, 128], sizes = [16, 128], strides = [1, 1]} : vector<16x512xbf16> to vector<16x128xbf16>
    %c16 = arith.constant 16 : index
    %c0_87 = arith.constant 0 : index
    %144 = vector.load %arg5[%c16, %c0_87] : memref<64x256xbf16, #tpu.memory_space<vmem>>, vector<16x128xbf16>
    tpu.vector_store %arg5[%c16, %c0_87], %143 {strides = array<i32>} : memref<64x256xbf16, #tpu.memory_space<vmem>>, vector<16x128xbf16>,
    %145 = vector.extract_strided_slice %140 {offsets = [0, 256], sizes = [16, 128], strides = [1, 1]} : vector<16x512xbf16> to vector<16x128xbf16>
    %c32 = arith.constant 32 : index
    %c0_88 = arith.constant 0 : index
    %146 = vector.load %arg5[%c32, %c0_88] : memref<64x256xbf16, #tpu.memory_space<vmem>>, vector<16x128xbf16>
    tpu.vector_store %arg5[%c32, %c0_88], %145 {strides = array<i32>} : memref<64x256xbf16, #tpu.memory_space<vmem>>, vector<16x128xbf16>,
    %147 = vector.extract_strided_slice %140 {offsets = [0, 384], sizes = [16, 128], strides = [1, 1]} : vector<16x512xbf16> to vector<16x128xbf16>
    %c48 = arith.constant 48 : index
    %c0_89 = arith.constant 0 : index
    %148 = vector.load %arg5[%c48, %c0_89] : memref<64x256xbf16, #tpu.memory_space<vmem>>, vector<16x128xbf16>
    tpu.vector_store %arg5[%c48, %c0_89], %147 {strides = array<i32>} : memref<64x256xbf16, #tpu.memory_space<vmem>>, vector<16x128xbf16>,
    %149 = arith.truncf %139 : vector<16x512xf32> to vector<16x512xbf16>
    %150 = vector.extract_strided_slice %149 {offsets = [0, 0], sizes = [16, 128], strides = [1, 1]} : vector<16x512xbf16> to vector<16x128xbf16>
    %c0_90 = arith.constant 0 : index
    %c128 = arith.constant 128 : index
    %151 = vector.load %arg5[%c0_90, %c128] : memref<64x256xbf16, #tpu.memory_space<vmem>>, vector<16x128xbf16>
    tpu.vector_store %arg5[%c0_90, %c128], %150 {strides = array<i32>} : memref<64x256xbf16, #tpu.memory_space<vmem>>, vector<16x128xbf16>,
    %152 = vector.extract_strided_slice %149 {offsets = [0, 128], sizes = [16, 128], strides = [1, 1]} : vector<16x512xbf16> to vector<16x128xbf16>
    %c16_91 = arith.constant 16 : index
    %c128_92 = arith.constant 128 : index
    %153 = vector.load %arg5[%c16_91, %c128_92] : memref<64x256xbf16, #tpu.memory_space<vmem>>, vector<16x128xbf16>
    tpu.vector_store %arg5[%c16_91, %c128_92], %152 {strides = array<i32>} : memref<64x256xbf16, #tpu.memory_space<vmem>>, vector<16x128xbf16>,
    %154 = vector.extract_strided_slice %149 {offsets = [0, 256], sizes = [16, 128], strides = [1, 1]} : vector<16x512xbf16> to vector<16x128xbf16>
    %c32_93 = arith.constant 32 : index
    %c128_94 = arith.constant 128 : index
    %155 = vector.load %arg5[%c32_93, %c128_94] : memref<64x256xbf16, #tpu.memory_space<vmem>>, vector<16x128xbf16>
    tpu.vector_store %arg5[%c32_93, %c128_94], %154 {strides = array<i32>} : memref<64x256xbf16, #tpu.memory_space<vmem>>, vector<16x128xbf16>,
    %156 = vector.extract_strided_slice %149 {offsets = [0, 384], sizes = [16, 128], strides = [1, 1]} : vector<16x512xbf16> to vector<16x128xbf16>
    %c48_95 = arith.constant 48 : index
    %c128_96 = arith.constant 128 : index
    %157 = vector.load %arg5[%c48_95, %c128_96] : memref<64x256xbf16, #tpu.memory_space<vmem>>, vector<16x128xbf16>
    tpu.vector_store %arg5[%c48_95, %c128_96], %156 {strides = array<i32>} : memref<64x256xbf16, #tpu.memory_space<vmem>>, vector<16x128xbf16>,
    %c0_97 = arith.constant 0 : index
    %c0_98 = arith.constant 0 : index
    %158 = vector.load %arg5[%c0_97, %c0_98] : memref<64x256xbf16, #tpu.memory_space<vmem>>, vector<64x256xbf16>
    %c0_99 = arith.constant 0 : index
    %c0_100 = arith.constant 0 : index
    %159 = vector.load %arg3[%c0_99, %c0_100] : memref<256x128xbf16, #tpu.memory_space<vmem>>, vector<256x128xbf16>
    %cst_101 = arith.constant dense<0.000000e+00> : vector<64x128xf32>
    %160 = tpu.matmul %158, %159, %cst_101 {dimension_numbers = #tpu.dot_dimension_numbers<[1], [0], [0], [1], [0, 0, 1, 1], [], []>} : vector<64x256xbf16>, vector<256x128xbf16>, vector<64x128xf32> -> vector<64x128xf32>
    %c0_102 = arith.constant 0 : index
    %c0_103 = arith.constant 0 : index
    %161 = vector.load %arg4[%c0_102, %c0_103] : memref<64x128xf32, #tpu.memory_space<vmem>>, vector<64x128xf32>
    tpu.vector_store %arg4[%c0_102, %c0_103], %160 {strides = array<i32>} : memref<64x128xf32, #tpu.memory_space<vmem>>, vector<64x128xf32>,
    return
  }
  func.func @transform_0(%arg0: i32) -> (i32, i32, i32) {
    %c0_i32 = arith.constant 0 : i32
    %c0_i32_0 = arith.constant 0 : i32
    %c0_i32_1 = arith.constant 0 : i32
    return %arg0, %c0_i32, %c0_i32_0 : i32, i32, i32
  }
  func.func @transform_1(%arg0: i32) -> (i32, i32, i32, i32) {
    %c0_i32 = arith.constant 0 : i32
    %c0_i32_0 = arith.constant 0 : i32
    %c0_i32_1 = arith.constant 0 : i32
    %c0_i32_2 = arith.constant 0 : i32
    %c0_i32_3 = arith.constant 0 : i32
    return %c0_i32, %c0_i32_0, %c0_i32_1, %c0_i32_2 : i32, i32, i32, i32
  }
  func.func @transform_2(%arg0: i32) -> (i32, i32) {
    %c0_i32 = arith.constant 0 : i32
    %c0_i32_0 = arith.constant 0 : i32
    %c0_i32_1 = arith.constant 0 : i32
    return %c0_i32, %c0_i32_0 : i32, i32
  }
  func.func @transform_3(%arg0: i32) -> (i32, i32) {
    %c0_i32 = arith.constant 0 : i32
    %c0_i32_0 = arith.constant 0 : i32
    return %arg0, %c0_i32 : i32, i32
  }
}

</mosaic_0001>

<bundles_post_ra>
// kernel: tpu_custom_call.1
= control target key start
LH: loop header
LB: loop body
LE: loop exit
PB: predicated region body
PF: predicated region fallthrough
CT: control target
= control target key end

     0   :  { %8 = vsyncpa [#allocation4], 0  ;;  %s2980_s0 = inlined_call_operand.hbm [shape: f32[2,16,512], index: 0, kind: input, shape index: {}]   ;;  %s2981_s1 = inlined_call_operand.hbm [shape: f32[2,9,1,512], index: 1, kind: input, shape index: {}]   ;;  %s2982_s2 = inlined_call_operand.hbm [shape: bf16[256,128], index: 2, kind: input, shape index: {}]   ;;  %s2983_s3 = inlined_call_operand.hbm [shape: f32[128,128], index: 3, kind: output, shape index: {}]  }
   0x1   :  { %10 = vsyncpa [#allocation4 + $0x1], 0 }
   0x2   :  { %11 = vsyncpa [#allocation7], 0 }
   0x3   :  { %12 = vsyncpa [#allocation5], 0 }
   0x4   :  { %14 = vsyncpa [#allocation5 + $0x1], 0  ;;  %s1905_s12 = smov 0   ;;  %s1907_s13 = smov 0  }
   0x5   :  { %s1909_s14 = smov 0   ;;  %s1911_s15 = smov 0  }
   0x6 LB: > { %s1926_s16 = sadd.s32 4294967295, %s1871_s15   ;;  %s1532_s17 = sadd.s32 4294967294, %s1871_s15   ;;  %s1871_s15 = sphi %s1911_s15, %s3051_s15   ;;  %s1867_s14 = sphi %s1909_s14, %s3050_s14   ;;  %s1863_s13 = sphi %s1907_s13, %s3049_s13   ;;  %s1859_s12 = sphi %s1905_s12, %s3048_s12  }
   0x7   : > { %p40_p0 = scmp.ne.s32.totalorder %s1863_s13, %s1859_s12  ;;  %p2984_p1 = scmp.eq.s32.totalorder %s1926_s16, 0 }
   0x8   : > { %p112_p3 = scmp.eq.s32.totalorder %s1532_s17, 1  ;;  %p1533_p5 = scmp.ge.s32.totalorder %s1871_s15, 1 }
   0x9   : > { %p1935_p4 = por %p2984_p1, %p40_p0  ;;  %p119_p7 = scmp.lt.s32.totalorder %s1871_s15, 3 }
   0xa   : > { %p1940_p6 = por %p112_p3, %p40_p0  ;;  %s1873_s21 = smov [#allocation6]  }
   0xb   : > { %s3009_s18 = scalar_select %p1935_p4, 1, 0 }
   0xc   : > { %s3010_s19 = scalar_select %p1940_p6, 1, 0 }
   0xd   : > { %p1945_p8 = pnand %p1533_p5, %p119_p7  ;;  %s131_s22 = sshll.u32 %s1873_s21, 4  ;;  %s1949_s22 = int_to_ptr.vmem [resolvable:$true] %s131_s22 }
   0xe   : > { %s1874_s24 = smov [#allocation8]   ;;  %s1715_s28 = scalar_lea.hbm %s2981_s1, 1152 }
   0xf   : > { %p1636_p9 = pneg %p1945_p8  ;;  %s144_s25 = sshll.u32 %s1874_s24, 4  ;;  %s1960_s25 = int_to_ptr.vmem [resolvable:$true] %s144_s25 }
  0x10   : > { %p1716_p12 = scmp.ne.s32.totalorder %s2981_s1, %s1715_s28  ;;  %p1722_p5 = scmp.lt.u32.totalorder %s1715_s28, %s2981_s1 }
  0x11   : > { %p1956_p11 = pnand %p1636_p9, %p2984_p1 }
  0x13   : > { %p1717_p13 = pneg %p1956_p11 }
  0x15   : > { %p1718_p0 = pnand %p1717_p13, %p1716_p12 }
  0x17   : > { %p1719_p3 = pneg %p1718_p0 }
  0x19   : > { %p1724_p7 = pnand %p1722_p5, %p1719_p3 }
  0x1b   : > { %1727 = shalt.err (!%p1724_p7)
}
  0x1c   : > { %s1728_s6 = scalar_lea.vmem %s1949_s22, 1152  ;;  %p1736_p2 = scmp.lt.s32.totalorder %s1949_s22, %s1949_s22 }
  0x1d   : > { %p1729_p9 = scmp.ne.s32.totalorder %s1949_s22, %s1728_s6  ;;  %p1737_p12 = scmp.lt.s32.totalorder %s1728_s6, %s1728_s6 }
  0x1f   : > { %p1731_p10 = pnand %p1729_p9, %p1717_p13  ;;  %p1738_p0 = por %p1737_p12, %p1736_p2 }
  0x21   : > { %p1732_p1 = pneg %p1731_p10 }
  0x23   : > { %p1739_p6 = pnand %p1738_p0, %p1732_p1 }
  0x25   : > { %1742 = shalt.err (!%p1739_p6)
}
  0x26   : > { %s1875_s7 = smov 64   ;;  %s1876_s8 = smov 4  }
  0x27   : > { %1639 = dma.hbm_to_vmem [thread:$0]  (!%p1956_p11), %s2981_s1, 1152, %s1949_s22, [#allocation7], %s1875_s7, %s1875_s7, %s1876_s8  }
  0x28   : > { %s1743_s21 = scalar_lea.hbm %s2982_s2, 2048 }
  0x29   : > { %p1744_p2 = scmp.ne.s32.totalorder %s2982_s2, %s1743_s21  ;;  %p1750_p10 = scmp.lt.u32.totalorder %s1743_s21, %s2982_s2 }
  0x2b   : > { %p1746_p1 = pnand %p1744_p2, %p1717_p13 }
  0x2d   : > { %p1747_p6 = pneg %p1746_p1 }
  0x2f   : > { %p1752_p3 = pnand %p1750_p10, %p1747_p6 }
  0x31   : > { %1755 = shalt.err (!%p1752_p3)
}
  0x32   : > { %s1756_s22 = scalar_lea.vmem %s1960_s25, 2048  ;;  %p1764_p12 = scmp.lt.s32.totalorder %s1960_s25, %s1960_s25 }
  0x33   : > { %p1757_p5 = scmp.ne.s32.totalorder %s1960_s25, %s1756_s22  ;;  %p1765_p0 = scmp.lt.s32.totalorder %s1756_s22, %s1756_s22 }
  0x35   : > { %p1759_p7 = pnand %p1757_p5, %p1717_p13  ;;  %p1766_p2 = por %p1765_p0, %p1764_p12 }
  0x37   : > { %p1760_p9 = pneg %p1759_p7 }
  0x39   : > { %p1767_p1 = pnand %p1766_p2, %p1760_p9 }
  0x3b   : > { %1770 = shalt.err (!%p1767_p1)
}
  0x3c   : > { %1642 = dma.hbm_to_vmem [thread:$0]  (!%p1956_p11), %s2982_s2, 2048, %s1960_s25, [#allocation7], %s1875_s7, %s1875_s7, %s1876_s8  }
  0x3d   : > { %s2015_s4 = sadd.s32 1, %s1871_s15   ;;  %s27_s23 = sadd.s32 1, %s1867_s14 }
  0x3e   : > { %s24_s5 = ssub.s32 %s1871_s15, %s2015_s4  ;;  %p34_p13 = scmp.ne.s32.totalorder %s1867_s14, %s1863_s13 }
  0x3f   : > { %p25_p6 = scmp.eq.s32.totalorder %s24_s5, 0  ;;  %p35_p10 = scmp.eq.s32.totalorder %s1871_s15, 0 }
  0x40   : > { %p3013_p3 = scmp.eq.s32.totalorder %s1926_s16, 1  ;;  %p1653_p7 = scmp.lt.s32.totalorder %s1871_s15, 2 }
  0x41   : > { %s2031_s9 = scalar_select %p25_p6, %s1867_s14, %s27_s23  }
  0x42   : > { %p2025_p5 = por %p3013_p3, %p34_p13  ;;  %p36_p9 = por %p35_p10, %p34_p13 }
  0x43   : > { %s158_s10 = sand.u32 1, %s1867_s14   ;;  %s1566_s25 = sshll.u32 %s1871_s15, 10 }
  0x44   : > { %s3014_s6 = scalar_select %p2025_p5, 1, 0 }
  0x45   : > { %s1537_s11 = sshll.u32 %s158_s10, 6  ;;  %s2038_s17 = scalar_lea.hbm %s2980_s0, %s1566_s25 }
  0x46   : > { %s162_s21 = scalar_lea.vmem [#allocation3], %s1537_s11  ;;  %p2042_p11 = pnand %p1653_p7, %p36_p9 }
  0x47   : > { %s169_s24 = sshll.u32 %s162_s21, 4  ;;  %s2046_s27 = scalar_lea.sflag [#allocation4], %s158_s10  ;;  %s2040_s24 = int_to_ptr.vmem [resolvable:$true] %s169_s24 }
  0x48   : > { %s1771_s28 = scalar_lea.hbm %s2038_s17, 1024  ;;  %p1773_p0 = pneg %p2042_p11 }
  0x49   : > { %p1772_p12 = scmp.ne.s32.totalorder %s2038_s17, %s1771_s28  ;;  %s1776_s30 = scalar_lea.hbm %s2980_s0, 2048 }
  0x4a   : > { %p1777_p13 = scmp.lt.u32.totalorder %s2038_s17, %s2980_s0  ;;  %p1778_p6 = scmp.lt.u32.totalorder %s1776_s30, %s1771_s28 }
  0x4b   : > { %p1774_p2 = pnand %p1773_p0, %p1772_p12  ;;  %p1780_p3 = scmp.lt.u32.totalorder %s1771_s28, %s2038_s17 }
  0x4c   : > { %p1779_p10 = por %p1778_p6, %p1777_p13 }
  0x4d   : > { %p1775_p1 = pneg %p1774_p2 }
  0x4e   : > { %p1781_p7 = por %p1780_p3, %p1779_p10 }
  0x50   : > { %p1782_p9 = pnand %p1781_p7, %p1775_p1 }
  0x52   : > { %1785 = shalt.err (!%p1782_p9)
}
  0x53   : > { %s1786_s10 = scalar_lea.vmem %s2040_s24, 1024  ;;  %s1877_s11 = smov [#allocation3]  }
  0x54   : > { %p1787_p12 = scmp.ne.s32.totalorder %s2040_s24, %s1786_s10  ;;  %s1791_s25 = sshll.u32 %s1877_s11, 4  ;;  %s1792_s25 = int_to_ptr.vmem [resolvable:$false] %s1791_s25 }
  0x55   : > { %s1793_s7 = scalar_lea.vmem %s1792_s25, 2048  ;;  %p1794_p4 = scmp.lt.s32.totalorder %s2040_s24, %s1792_s25 }
  0x56   : > { %p1789_p2 = pnand %p1787_p12, %p1773_p0  ;;  %p1795_p13 = scmp.lt.s32.totalorder %s1793_s7, %s1786_s10 }
  0x58   : > { %p1790_p5 = pneg %p1789_p2  ;;  %p1796_p6 = por %p1795_p13, %p1794_p4 }
  0x5a   : > { %p1797_p10 = pnand %p1796_p6, %p1790_p5 }
  0x5c   : > { %1800 = shalt.err (!%p1797_p10)
}
  0x5d   : > { %s1878_s8 = smov 512   ;;  %s1879_s21 = smov 32  }
  0x5e   : > { %1646 = dma.hbm_to_vmem [thread:$0]  (!%p2042_p11), %s2038_s17, 1024, %s2040_s24, %s2046_s27, %s1878_s8, %s1878_s8, %s1879_s21  }
  0x5f   : > { %181 = sbr.rel (%p1945_p8) target bundleno = 574 (0x23e), region = 32 }
  0x66   : > { %s2077_s28 = sand.u32 1, %s1863_s13   ;;  %p3016_p4 = scmp.ne.s32.totalorder %s3009_s18, 0 }
  0x67   : > { %s1541_s22 = sshll.u32 %s2077_s28, 6  ;;  %s184_s29 = scalar_lea.sflag [#allocation4], %s2077_s28 }
  0x68   : > { %s2083_s30 = scalar_lea.vmem [#allocation3], %s1541_s22 }
  0x69   : > { %1846 = dma.done.wait (%p3016_p4), %s184_s29, 1024  }
  0x6a   : > { %1848 = vsyncadd (%p3016_p4), %s184_s29, 4294966272  ;;  %p3017_p5 = scmp.eq.s32.totalorder %s1926_s16, 0 }
  0x6c   : > { %1850 = dma.done.wait (%p3017_p5), [#allocation7], 3200   ;;  %p3018_p8 = pmov %p3017_p5 }
  0x6d   : > { %v228_v0 = vlaneseq  ;;  %v2110_v7 = vld [vmem:[%s2083_s30 + $0x18] sm:$0xff]  ;;  %v470_v9 = vld [vmem:[#allocation6 + $0x4] sm:$0xf]  ;;  %v509_v14 = vld [vmem:[#allocation6 + $0x28] sm:$0xf]  ;;  %s1880_s18 = smov 32  }
  0x6e   : > { %1852 = vsyncadd (%p3018_p8), [#allocation7], 4294964096  ;;  %v2113_v8 = vld [vmem:[%s2083_s30 + $0x38] sm:$0xff]  ;;  %v337_v11 = vrot.slane %v2110_v7, 7  ;;  %v2124_v15 = vld [vmem:[%s2083_s30] sm:$0xff]  ;;  %v881_v62 = vrot.slane %v2110_v7, 1 }
  0x6f   : > { %v2094_v1 = vshrl.u32 %v228_v0, 7  ;;  %v341_v12 = vrot.slane %v2113_v8, 7  ;;  %v2127_v16 = vld [vmem:[%s2083_s30 + $0x20] sm:$0xff]  ;;  %v334_v19 = vrot.slane %v2124_v15, 7  ;;  %v2135_v22 = vld [vmem:[%s2083_s30 + $0x8] sm:$0xff]  ;;  %v2148_v28 = vld [vmem:[%s2083_s30 + $0x10] sm:$0xff] }
  0x70   : > { %v338_v20 = vrot.slane %v2127_v16, 7  ;;  %v2138_v23 = vld [vmem:[%s2083_s30 + $0x28] sm:$0xff]  ;;  %v335_v25 = vrot.slane %v2135_v22, 7  ;;  %v2162_v33 = vld [vmem:[%s2083_s30 + $0x30] sm:$0xff]  ;;  %v336_v41 = vrot.slane %v2148_v28, 7  ;;  %v885_v63 = vrot.slane %v2113_v8, 1 }
  0x71   : > { %v235_v2 = vand.u32 15, %v2094_v1  ;;  %v2098_v3 = vsub.s32 0, %v2094_v1  ;;  %v2101_v4 = vsub.s32 1, %v2094_v1  ;;  %v2104_v5 = vsub.s32 2, %v2094_v1  ;;  %s1881_s20 = smov 96   ;;  %s2919_s17 = scalar_lea.vmem [#allocation9], %s1541_s22 }
  0x72   : > { %v2107_v6 = vsub.s32 3, %v2094_v1  ;;  %vm342_vm0 = vcmp.lt.s32.totalorder %v2094_v1, 1  ;;  %v339_v26 = vrot.slane %v2138_v23, 7  ;;  %v340_v44 = vrot.slane %v2162_v33, 7  ;;  %s1440_s24 = sshll.u32 %s2919_s17, 4  ;;  %s1567_s26 = sshll.u32 %s1926_s16, 10  ;;  %s2929_s24 = int_to_ptr.vmem [resolvable:$true] %s1440_s24 }
  0x73   : > { %3019 = vst [vmem:[#allocation13_spill] sm:$0xff] %v2104_v5  ;;  %vm2116_vm1 = vcmp.ge.s32.totalorder %v235_v2, 1  ;;  %v475_v17 = vrot.slane %v470_v9, %v2098_v3  ;;  %v514_v21 = vrot.slane %v509_v14, %v2098_v3  ;;  %v2142_v24 = vsel %vm342_vm0, %v337_v11, %v341_v12  ;;  %s2934_s5 = scalar_lea.hbm %s2983_s3, %s1567_s26  ;;  %s1427_s10 = scalar_lea.sflag [#allocation5], %s2077_s28 }
  0x74   : > { %3020 = vst [vmem:[#allocation14_spill] sm:$0xff] %v2107_v6  ;;  %v487_v13 = vrot.slane %v470_v9, %v2107_v6  ;;  %v526_v18 = vrot.slane %v509_v14, %v2107_v6  ;;  %v479_v27 = vrot.slane %v470_v9, %v2101_v4  ;;  %373 = vrot.lane.b32.xlu1 %v2142_v24, %s1880_s18  ;;  %vm886_vm2 = vcmp.lt.s32.totalorder %v2094_v1, 7  ;;  %s1801_s11 = scalar_lea.vmem %s2929_s24, 1024  ;;  %p3045_p0 = scmp.ne.s32.totalorder %s3014_s6, 0 }
  0x75   : > { %v343_v31 = vsel %vm342_vm0, %v334_v19, %v338_v20  ;;  %v518_v32 = vrot.slane %v509_v14, %v2101_v4  ;;  %v344_v36 = vsel %vm342_vm0, %v335_v25, %v339_v26  ;;  %v347_v37 = vsel %vm342_vm0, %v338_v20, %v334_v19  ;;  %p1802_p11 = scmp.ne.s32.totalorder %s2929_s24, %s1801_s11  ;;  %s1882_s16 = smov [#allocation9]  }
  0x76   : > { %v2153_v29 = vmul.f32 %v487_v13, %v2142_v24  ;;  %v2156_v30 = vmul.f32 %v526_v18, %v2142_v24  ;;  %361 = vrot.lane.b32.xlu0 %v343_v31, %s1880_s18  ;;  %v2165_v34 = vmul.f32 %v475_v17, %v343_v31  ;;  %v2167_v35 = vmul.f32 %v514_v21, %v343_v31  ;;  %s1805_s25 = sshll.u32 %s1882_s16, 4  ;;  %s1806_s25 = int_to_ptr.vmem [resolvable:$false] %s1805_s25 }
  0x77   : > { %v2173_v38 = vmul.f32 %v479_v27, %v344_v36  ;;  %v2175_v39 = vmul.f32 %v518_v32, %v344_v36  ;;  %v351_v40 = vsel %vm2116_vm1, %v347_v37, 0.0  ;;  %v483_v45 = vrot.slane %v470_v9, %v2104_v5  ;;  %p1803_p1 = pnand %p1802_p11, %p3045_p0  ;;  %s1807_s7 = scalar_lea.vmem %s1806_s25, 2048 }
  0x78   : > { %v2180_v42 = vmul.f32 %v475_v17, %v351_v40  ;;  %v2182_v43 = vmul.f32 %v514_v21, %v351_v40  ;;  %365 = vrot.lane.b32.xlu1 %v344_v36, %s1880_s18  ;;  %v522_v46 = vrot.slane %v509_v14, %v2104_v5  ;;  %v348_v47 = vsel %vm342_vm0, %v339_v26, %v335_v25  ;;  %p1808_p7 = scmp.lt.s32.totalorder %s2929_s24, %s1806_s25  ;;  %p1809_p9 = scmp.lt.s32.totalorder %s1807_s7, %s1801_s11 }
  0x79   : > { %v350_v48 = vsel %vm342_vm0, %v341_v12, %v337_v11  ;;  %v345_v49 = vsel %vm342_vm0, %v336_v41, %v340_v44  ;;  %v352_v50 = vsel %vm2116_vm1, %v348_v47, 0.0  ;;  %v349_v52 = vsel %vm342_vm0, %v340_v44, %v336_v41  ;;  %v273_v12 = vld [vmem:[#allocation6 + $0x10] sm:$0xf]  ;;  %p1804_p3 = pneg %p1803_p1 }
  0x7a   : > { %359 = vrot.lane.b32.xlu0 %v351_v40, %s1880_s18  ;;  %v354_v51 = vsel %vm2116_vm1, %v350_v48, 0.0  ;;  %v2201_v53 = vmul.f32 %v483_v45, %v345_v49  ;;  %v2203_v54 = vmul.f32 %v522_v46, %v345_v49  ;;  %v2205_v55 = vmul.f32 %v479_v27, %v352_v50  ;;  %p1810_p12 = por %p1809_p9, %p1808_p7 }
  0x7b   : > { %v2207_v56 = vmul.f32 %v518_v32, %v352_v50  ;;  %v2209_v57 = vmul.f32 %v487_v13, %v354_v51  ;;  %v2211_v58 = vmul.f32 %v526_v18, %v354_v51  ;;  %v353_v59 = vsel %vm2116_vm1, %v349_v52, 0.0  ;;  %v304_v13 = vld [vmem:[#allocation6 + $0x34] sm:$0xf] }
  0x7c   : > { %369 = vrot.lane.b32.xlu1 %v345_v49, %s1880_s18  ;;  %v2216_v60 = vmul.f32 %v483_v45, %v353_v59  ;;  %v2218_v61 = vmul.f32 %v522_v46, %v353_v59  ;;  %v879_v2 = vrot.slane %v2135_v22, 1  ;;  %v883_v9 = vrot.slane %v2138_v23, 1  ;;  %p1811_p2 = pnand %p1810_p12, %p1804_p3 }
  0x7d   : > { %v2228_v10 = vsel %vm886_vm2, %v885_v63, %v881_v62  ;;  %v2232_v11 = vsel %vm886_vm2, %v881_v62, %v885_v63  ;;  %v880_v18 = vrot.slane %v2148_v28, 1  ;;  %v884_v19 = vrot.slane %v2162_v33, 1 }
  0x7e   : > { %363 = vrot.lane.b32.xlu0 %v352_v50, %s1880_s18  ;;  %3023 = vst [vmem:[#allocation15_spill] sm:$0xff] %v2232_v11  ;;  %v2238_v14 = vsel %vm886_vm2, %v883_v9, %v879_v2  ;;  %v2242_v17 = vsel %vm886_vm2, %v879_v2, %v883_v9  ;;  %v278_v20 = vrot.slane %v273_v12, %v2098_v3 }
  0x7f   : > { %3024 = vst [vmem:[#allocation16_spill] sm:$0xff] %v2242_v17  ;;  %v309_v21 = vrot.slane %v304_v13, %v2098_v3  ;;  %v2252_v25 = vsel %vm886_vm2, %v884_v19, %v880_v18  ;;  %v2256_v26 = vsel %vm886_vm2, %v880_v18, %v884_v19  ;;  %v313_v37 = vrot.slane %v304_v13, %v2101_v4 }
  0x80   : > { %371 = vrot.lane.b32.xlu1 %v354_v51, %s1880_s18  ;;  %3025 = vst [vmem:[#allocation17_spill] sm:$0xff] %v2256_v26  ;;  %v2259_v27 = vmul.f32 %v278_v20, %v2127_v16  ;;  %v290_v41 = vrot.slane %v273_v12, %v2107_v6  ;;  %v317_v44 = vrot.slane %v304_v13, %v2104_v5 }
  0x81   : > { %v2262_v32 = vmul.f32 %v309_v21, %v2127_v16  ;;  %v2275_v46 = vmul.f32 %v313_v37, %v2138_v23  ;;  %v321_v47 = vrot.slane %v304_v13, %v2107_v6  ;;  %v2295_v63 = vmul.f32 %v313_v37, %v2135_v22  ;;  %v1702_v37 = vld [vmem:[#allocation8 + $0x8] sm:$0xff]  }
  0x82   : > { %367 = vrot.lane.b32.xlu0 %v353_v59, %s1880_s18  ;;  %v2285_v52 = vmul.f32 %v317_v44, %v2162_v33  ;;  %v2298_v2 = vmul.f32 %v278_v20, %v2124_v15  ;;  %v2301_v9 = vmul.f32 %v309_v21, %v2124_v15  ;;  %v2308_v13 = vmul.f32 %v290_v41, %v2110_v7 }
  0x83   : > { %v2288_v62 = vmul.f32 %v321_v47, %v2113_v8  ;;  %v2311_v18 = vmul.f32 %v317_v44, %v2148_v28  ;;  %v878_v20 = vrot.slane %v2124_v15, 1  ;;  %v882_v21 = vrot.slane %v2127_v16, 1 }
  0x84   : > { %549 = vrot.lane.b32.xlu1 %v343_v31, %s1881_s20  ;;  %v282_v31 = vrot.slane %v273_v12, %v2101_v4 }
  0x86   : > { %547 = vrot.lane.b32.xlu0 %v351_v40, %s1881_s20  ;;  %v286_v40 = vrot.slane %v273_v12, %v2104_v5  ;;  %v2272_v45 = vmul.f32 %v282_v31, %v2138_v23 }
  0x88   : > { %553 = vrot.lane.b32.xlu1 %v344_v36, %s1881_s20  ;;  %v2279_v48 = vmul.f32 %v286_v40, %v2162_v33  ;;  %v2282_v36 = vmul.f32 %v290_v41, %v2113_v8  ;;  %v2304_v12 = vmul.f32 %v286_v40, %v2148_v28  ;;  %v1705_v40 = vld [vmem:[#allocation8 + $0x58] sm:$0xff]   ;;  %v1708_v41 = vld [vmem:[#allocation8 + $0x20] sm:$0xff]  }
  0x8a   : > { %551 = vrot.lane.b32.xlu0 %v352_v50, %s1881_s20  ;;  %v2291_v50 = vmul.f32 %v282_v31, %v2135_v22  ;;  %v1701_v31 = vld [vmem:[#allocation8 + $0x48] sm:$0xff]  }
  0x8c   : > { %557 = vrot.lane.b32.xlu1 %v345_v49, %s1881_s20  ;;  %v2314_v49 = vmul.f32 %v321_v47, %v2110_v7  ;;  %v1710_v47 = vld [vmem:[#allocation8 + $0x28] sm:$0xff]  }
  0x8e   : > { %555 = vrot.lane.b32.xlu0 %v353_v59, %s1881_s20  ;;  %v1700_v59 = vld [vmem:[#allocation8] sm:$0xff]  }
  0x90   : > { %561 = vrot.lane.b32.xlu1 %v2142_v24, %s1881_s20  ;;  %v230_v24 = vadd.s32 8, %v2094_v1  ;;  %v1707_v1 = vld [vmem:[#allocation8 + $0x60] sm:$0xff]  }
  0x92   : > { %559 = vrot.lane.b32.xlu0 %v354_v51, %s1881_s20  ;;  %v1699_v51 = vld [vmem:[#allocation8 + $0x40] sm:$0xff]   ;;  %v242_v19 = vand.u32 15, %v230_v24 }
  0x93   : > { %1568 = vmatprep.subr.bf16.mxu0 %v1699_v51  ;;  %1608 = vmatprep.subr.bf16.mxu1 %v1699_v51  ;;  %v1712_v51 = vld [vmem:[#allocation8 + $0x30] sm:$0xff]  }
  0x94   : > { %660 = vrot.lane.b32.xlu1 %v2127_v16, %s1880_s18  ;;  %1569 = vmatpush3.bf16.msra.mxu0 %v1700_v59  ;;  %vm2350_vm3 = vcmp.lt.s32.totalorder %v242_v19, 15  ;;  %v1714_v19 = vld [vmem:[#allocation8 + $0x38] sm:$0xff]  }
  0x95   : > { %1616 = vmatpush3.bf16.msra.mxu1 %v1700_v59  ;;  %1570 = vmatprep.subr.bf16.mxu0 %v1701_v31  ;;  %v2384_v44 = vsel %vm2350_vm3, %v2238_v14, 0.0  ;;  %v2393_v24 = vsel %vm2350_vm3, %v2252_v25, 0.0  ;;  %v1711_v14 = vld [vmem:[#allocation8 + $0x70] sm:$0xff]   ;;  %v1713_v59 = vld [vmem:[#allocation8 + $0x78] sm:$0xff]   ;;  %v2416_v25 = vand.u32 127, %v228_v0 }
  0x96   : > { %658 = vrot.lane.b32.xlu0 %v2124_v15, %s1880_s18  ;;  %1609 = vmatprep.subr.bf16.mxu1 %v1701_v31  ;;  %3031 = vst [vmem:[#allocation21_spill] sm:$0xff] %v2384_v44  ;;  %3032 = vst [vmem:[#allocation22_spill] sm:$0xff] %v2393_v24 }
  0x97   : > { %vm375_vm4 = vcmp.lt.s32.totalorder %v2416_v25, 32  ;;  %vm268_vm5 = vcmp.ge.s32.totalorder %v2416_v25, 32  ;;  %vm563_vm6 = vcmp.lt.s32.totalorder %v2416_v25, 96 }
  0x98   : > { %672 = vrot.lane.b32.xlu1 %v2113_v8, %s1880_s18  ;;  %1571 = vmatpush3.bf16.msra.mxu0 %v1702_v37 }
  0x99   : > { %1617 = vmatpush3.bf16.msra.mxu1 %v1702_v37 }
  0x9a   : > { %670 = vrot.lane.b32.xlu0 %v2110_v7, %s1880_s18 }
  0x9c   : > { %664 = vrot.lane.b32.xlu1 %v2138_v23, %s1880_s18 }
  0x9e   : > { %662 = vrot.lane.b32.xlu0 %v2135_v22, %s1880_s18 }
  0xa0   : > { %668 = vrot.lane.b32.xlu1 %v2162_v33, %s1880_s18 }
  0xa2   : > { %666 = vrot.lane.b32.xlu0 %v2148_v28, %s1880_s18 }
  0xa4   : > { %770 = vrot.lane.b32.xlu1 %v2127_v16, %s1881_s20  ;;  %v1703_v16 = vld [vmem:[#allocation8 + $0x50] sm:$0xff]  }
  0xa5   : > { %1572 = vmatprep.subr.bf16.mxu0 %v1703_v16  ;;  %1610 = vmatprep.subr.bf16.mxu1 %v1703_v16 }
  0xa6   : > { %768 = vrot.lane.b32.xlu0 %v2124_v15, %s1881_s20  ;;  %v891_v15 = vsel %vm886_vm2, %v882_v21, %v878_v20 }
  0xa8   : > { %774 = vrot.lane.b32.xlu1 %v2138_v23, %s1881_s20  ;;  %v1704_v23 = vld [vmem:[#allocation8 + $0x10] sm:$0xff]  }
  0xa9   : > { %1573 = vmatpush3.bf16.msra.mxu0 %v1704_v23  ;;  %1618 = vmatpush3.bf16.msra.mxu1 %v1704_v23 }
  0xaa   : > { %772 = vrot.lane.b32.xlu0 %v2135_v22, %s1881_s20  ;;  %1574 = vmatprep.subr.bf16.mxu0 %v1705_v40 }
  0xab   : > { %1611 = vmatprep.subr.bf16.mxu1 %v1705_v40 }
  0xac   : > { %778 = vrot.lane.b32.xlu1 %v2162_v33, %s1881_s20  ;;  %v2366_v33 = vsel %vm886_vm2, %v878_v20, %v882_v21  ;;  %v392_v20 = vld [vmem:[#allocation6] sm:$0xf]  ;;  %v431_v21 = vld [vmem:[#allocation6 + $0x24] sm:$0xf] }
  0xad   : > { %3029 = vst [vmem:[#allocation19_spill] sm:$0xff] %v2366_v33  ;;  %v397_v37 = vrot.slane %v392_v20, %v2098_v3  ;;  %v436_v22 = vrot.slane %v431_v21, %v2098_v3  ;;  %v401_v23 = vrot.slane %v392_v20, %v2101_v4  ;;  %v440_v0 = vrot.slane %v431_v21, %v2101_v4 }
  0xae   : > { %776 = vrot.lane.b32.xlu0 %v2148_v28, %s1881_s20  ;;  %v2362_v28 = vsel %vm2350_vm3, %v891_v15, 0.0 }
  0xaf   : > { %3028 = vst [vmem:[#allocation18_spill] sm:$0xff] %v2362_v28 }
  0xb0   : > { %782 = vrot.lane.b32.xlu1 %v2113_v8, %s1881_s20  ;;  %v1706_v8 = vld [vmem:[#allocation8 + $0x18] sm:$0xff]  }
  0xb1   : > { %1575 = vmatpush3.bf16.msra.mxu0 %v1706_v8  ;;  %1619 = vmatpush3.bf16.msra.mxu1 %v1706_v8 }
  0xb2   : > { %780 = vrot.lane.b32.xlu0 %v2110_v7, %s1881_s20  ;;  %v2375_v7 = vsel %vm2350_vm3, %v2228_v10, 0.0  ;;  %1576 = vmatprep.subr.bf16.mxu0 %v1707_v1  ;;  %v1709_v10 = vld [vmem:[#allocation8 + $0x68] sm:$0xff]  }
  0xb3   : > { %3030 = vst [vmem:[#allocation20_spill] sm:$0xff] %v2375_v7  ;;  %1612 = vmatprep.subr.bf16.mxu1 %v1707_v1 }
  0xb4   : > { %905 = vrot.lane.b32.xlu1 %v2362_v28, %s1880_s18 }
  0xb5   : > { %1577 = vmatpush3.bf16.msra.mxu0 %v1708_v41  ;;  %1620 = vmatpush3.bf16.msra.mxu1 %v1708_v41 }
  0xb6   : > { %903 = vrot.lane.b32.xlu0 %v2366_v33, %s1880_s18  ;;  %1578 = vmatprep.subr.bf16.mxu0 %v1709_v10 }
  0xb7   : > { %1613 = vmatprep.subr.bf16.mxu1 %v1709_v10  ;;  %v405_v10 = vrot.slane %v392_v20, %v2104_v5 }
  0xb8   : > { %917 = vrot.lane.b32.xlu1 %v2375_v7, %s1880_s18 }
  0xb9   : > { %1579 = vmatpush3.bf16.msra.mxu0 %v1710_v47  ;;  %1621 = vmatpush3.bf16.msra.mxu1 %v1710_v47 }
  0xba   : > { %915 = vrot.lane.b32.xlu0 %v2232_v11, %s1880_s18  ;;  %1580 = vmatprep.subr.bf16.mxu0 %v1711_v14 }
  0xbb   : > { %1614 = vmatprep.subr.bf16.mxu1 %v1711_v14 }
  0xbc   : > { %909 = vrot.lane.b32.xlu1 %v2384_v44, %s1880_s18 }
  0xbd   : > { %1581 = vmatpush3.bf16.msra.mxu0 %v1712_v51  ;;  %1622 = vmatpush3.bf16.msra.mxu1 %v1712_v51  ;;  %v409_v51 = vrot.slane %v392_v20, %v2107_v6 }
  0xbe   : > { %907 = vrot.lane.b32.xlu0 %v2242_v17, %s1880_s18  ;;  %1582 = vmatprep.subr.bf16.mxu0 %v1713_v59 }
  0xbf   : > { %1615 = vmatprep.subr.bf16.mxu1 %v1713_v59  ;;  %v444_v59 = vrot.slane %v431_v21, %v2104_v5 }
  0xc0   : > { %913 = vrot.lane.b32.xlu1 %v2393_v24, %s1880_s18 }
  0xc1   : > { %1583 = vmatpush3.bf16.msra.mxu0 %v1714_v19  ;;  %1623 = vmatpush3.bf16.msra.mxu1 %v1714_v19  ;;  %v448_v19 = vrot.slane %v431_v21, %v2107_v6 }
  0xc2   : > { %911 = vrot.lane.b32.xlu0 %v2256_v26, %s1880_s18 }
  0xc4   : > { %1093 = vrot.lane.b32.xlu1 %v2362_v28, %s1881_s20 }
  0xc6   : > { %1091 = vrot.lane.b32.xlu0 %v2366_v33, %s1881_s20 }
  0xc8   : > { %1097 = vrot.lane.b32.xlu1 %v2384_v44, %s1881_s20 }
  0xca   : > { %1095 = vrot.lane.b32.xlu0 %v2242_v17, %s1881_s20 }
  0xcc   : > { %1101 = vrot.lane.b32.xlu1 %v2393_v24, %s1881_s20 }
  0xce   : > { %1099 = vrot.lane.b32.xlu0 %v2256_v26, %s1881_s20 }
  0xd0   : > { %1105 = vrot.lane.b32.xlu1 %v2375_v7, %s1881_s20  ;;  %v2438_v7 = vld [vmem:[#allocation6 + $0x8] sm:$0xf] }
  0xd2   : > { %1103 = vrot.lane.b32.xlu0 %v2232_v11, %s1881_s20 }
  0xe6   : > { %v374_v31 = vpop.permute.xlu1 %373 }
  0xe8   : > { %v362_v15 = vpop.permute.xlu0 %361 }
  0xe9   : > { %v383_v16 = vsel %vm375_vm4, %v374_v31, %v362_v15 }
  0xea   : > { %v388_v40 = vsel %vm268_vm5, %v383_v16, 0.0  ;;  %v366_v41 = vpop.permute.xlu1 %365 }
  0xeb   : > { %v418_v8 = vmul.f32 %v397_v37, %v388_v40  ;;  %v457_v1 = vmul.f32 %v436_v22, %v388_v40  ;;  %v381_v47 = vsel %vm375_vm4, %v362_v15, %v366_v41 }
  0xec   : > { %v360_v14 = vpop.permute.xlu0 %359  ;;  %v419_v16 = vmul.f32 %v401_v23, %v381_v47  ;;  %v458_v17 = vmul.f32 %v440_v0, %v381_v47 }
  0xed   : > { %v426_v24 = vadd.f32 %v418_v8, %v2259_v27  ;;  %v465_v26 = vadd.f32 %v457_v1, %v2262_v32  ;;  %v2451_v1 = vld [vmem:[#allocation6 + $0x2c] sm:$0xf] }
  0xee   : > { %v427_v40 = vadd.f32 %v419_v16, %v2272_v45  ;;  %v466_v44 = vadd.f32 %v458_v17, %v2275_v46  ;;  %v370_v11 = vpop.permute.xlu1 %369 }
  0xef   : > { %v2441_v15 = vadd.f32 %v2165_v34, %v426_v24  ;;  %v2444_v20 = vadd.f32 %v2167_v35, %v465_v26  ;;  %v377_v27 = vsel %vm375_vm4, %v370_v11, %v374_v31  ;;  %v379_v32 = vsel %vm375_vm4, %v366_v41, %v370_v11 }
  0xf0   : > { %v364_v21 = vpop.permute.xlu0 %363  ;;  %v420_v45 = vmul.f32 %v405_v10, %v379_v32  ;;  %v421_v17 = vmul.f32 %v409_v51, %v377_v27  ;;  %v459_v46 = vmul.f32 %v444_v59, %v379_v32  ;;  %v460_v8 = vmul.f32 %v448_v19, %v377_v27 }
  0xf1   : > { %v380_v34 = vsel %vm375_vm4, %v360_v14, %v364_v21  ;;  %v586_v35 = vrot.slane %v2438_v7, %v2098_v3  ;;  %v2458_v26 = vadd.f32 %v2173_v38, %v427_v40  ;;  %v2461_v11 = vadd.f32 %v2175_v39, %v466_v44 }
  0xf2   : > { %v428_v24 = vadd.f32 %v420_v45, %v2279_v48  ;;  %v429_v31 = vadd.f32 %v421_v17, %v2282_v36  ;;  %v467_v41 = vadd.f32 %v459_v46, %v2285_v52  ;;  %v468_v47 = vadd.f32 %v460_v8, %v2288_v62  ;;  %v372_v16 = vpop.permute.xlu1 %371 }
  0xf3   : > { %v415_v27 = vmul.f32 %v401_v23, %v380_v34  ;;  %v454_v32 = vmul.f32 %v440_v0, %v380_v34  ;;  %v382_v33 = vsel %vm375_vm4, %v372_v16, %v360_v14  ;;  %v625_v38 = vrot.slane %v2451_v1, %v2098_v3 }
  0xf4   : > { %v368_v28 = vpop.permute.xlu0 %367  ;;  %v2472_v39 = vadd.f32 %v2153_v29, %v429_v31  ;;  %v2475_v48 = vadd.f32 %v2156_v30, %v468_v47  ;;  %v384_v36 = vsel %vm268_vm5, %v382_v33, 0.0  ;;  %v2486_v30 = vadd.f32 %v2201_v53, %v428_v24 }
  0xf5   : > { %v376_v52 = vsel %vm375_vm4, %v368_v28, %v372_v16  ;;  %v423_v62 = vadd.f32 %v415_v27, %v2291_v50  ;;  %v462_v44 = vadd.f32 %v454_v32, %v2295_v63  ;;  %v414_v23 = vmul.f32 %v397_v37, %v384_v36 }
  0xf6   : > { %v453_v0 = vmul.f32 %v436_v22, %v384_v36  ;;  %v378_v14 = vsel %vm375_vm4, %v364_v21, %v368_v28  ;;  %v417_v29 = vmul.f32 %v409_v51, %v376_v52  ;;  %v456_v40 = vmul.f32 %v448_v19, %v376_v52  ;;  %v550_v45 = vpop.permute.xlu1 %549 }
  0xf7   : > { %v422_v33 = vadd.f32 %v414_v23, %v2298_v2  ;;  %v416_v46 = vmul.f32 %v405_v10, %v378_v14  ;;  %v455_v8 = vmul.f32 %v444_v59, %v378_v14  ;;  %v501_v22 = vadd.f32 %v2205_v55, %v423_v62 }
  0xf8   : > { %v461_v17 = vadd.f32 %v453_v0, %v2301_v9  ;;  %v548_v50 = vpop.permute.xlu0 %547  ;;  %v425_v63 = vadd.f32 %v417_v29, %v2308_v13  ;;  %v464_v37 = vadd.f32 %v456_v40, %v2314_v49  ;;  %v540_v28 = vadd.f32 %v2207_v56, %v462_v44 }
  0xf9   : > { %v424_v51 = vadd.f32 %v416_v46, %v2304_v12  ;;  %v463_v53 = vadd.f32 %v455_v8, %v2311_v18  ;;  %v500_v19 = vadd.f32 %v2180_v42, %v422_v33  ;;  %v545_v49 = vadd.f32 %v2203_v54, %v467_v41 }
  0xfa   : > { %v539_v2 = vadd.f32 %v2182_v43, %v461_v17  ;;  %v2499_v9 = vadd.f32 %v2209_v57, %v425_v63  ;;  %v2502_v10 = vadd.f32 %v2211_v58, %v464_v37  ;;  %v554_v13 = vpop.permute.xlu1 %553  ;;  %v590_v12 = vrot.slane %v2438_v7, %v2101_v4 }
  0xfb   : > { %v569_v55 = vsel %vm563_vm6, %v550_v45, %v554_v13  ;;  %v502_v42 = vadd.f32 %v2216_v60, %v424_v51  ;;  %v541_v43 = vadd.f32 %v2218_v61, %v463_v53  ;;  %v629_v59 = vrot.slane %v2451_v1, %v2101_v4 }
  0xfc   : > { %v552_v56 = vpop.permute.xlu0 %551  ;;  %v607_v18 = vmul.f32 %v586_v35, %v569_v55  ;;  %v646_v57 = vmul.f32 %v625_v38, %v569_v55  ;;  %v2516_v34 = vadd.s32 384, %v2416_v25  ;;  %v594_v31 = vrot.slane %v2438_v7, %v2104_v5 }
  0xfd   : > { %v568_v58 = vsel %vm563_vm6, %v548_v50, %v552_v56  ;;  %v598_v27 = vrot.slane %v2438_v7, %v2107_v6  ;;  %v637_v62 = vrot.slane %v2451_v1, %v2107_v6 }
  0xfe   : > { %v603_v54 = vmul.f32 %v586_v35, %v568_v58  ;;  %v642_v21 = vmul.f32 %v625_v38, %v568_v58  ;;  %3033 = vst [vmem:[#allocation23_spill] sm:$0xff] %v2516_v34  ;;  %v2519_v24 = vadd.f32 %v607_v18, %v2441_v15  ;;  %v2522_v60 = vadd.f32 %v646_v57, %v2444_v20  ;;  %v558_v61 = vpop.permute.xlu1 %557 }
  0xff   : > { %v567_v35 = vsel %vm563_vm6, %v554_v13, %v558_v61  ;;  %v633_v38 = vrot.slane %v2451_v1, %v2104_v5  ;;  %vm267_vm7 = vcmp.lt.s32.totalorder %v2516_v34, 480 }
 0x100   : > { %v2526_v41 = vadd.f32 %v603_v54, %v500_v19  ;;  %v2528_v47 = vadd.f32 %v642_v21, %v539_v2  ;;  %v556_v16 = vpop.permute.xlu0 %555  ;;  %v608_v15 = vmul.f32 %v590_v12, %v567_v35  ;;  %v647_v32 = vmul.f32 %v629_v59, %v567_v35  ;;  %v691_v19 = vld [vmem:[#allocation6 + $0xc] sm:$0xf]  ;;  %v730_v2 = vld [vmem:[#allocation6 + $0x30] sm:$0xf] }
 0x101   : > { %v566_v20 = vsel %vm563_vm6, %v552_v56, %v556_v16  ;;  %v696_v57 = vrot.slane %v691_v19, %v2098_v3  ;;  %v735_v58 = vrot.slane %v730_v2, %v2098_v3  ;;  %v700_v21 = vrot.slane %v691_v19, %v2101_v4 }
 0x102   : > { %v604_v36 = vmul.f32 %v590_v12, %v566_v20  ;;  %v643_v52 = vmul.f32 %v629_v59, %v566_v20  ;;  %v2542_v44 = vadd.f32 %v608_v15, %v2458_v26  ;;  %v2545_v7 = vadd.f32 %v647_v32, %v2461_v11  ;;  %v562_v23 = vpop.permute.xlu1 %561 }
 0x103   : > { %v565_v29 = vsel %vm563_vm6, %v558_v61, %v562_v23  ;;  %v571_v40 = vsel %vm563_vm6, %v562_v23, %v550_v45  ;;  %v739_v61 = vrot.slane %v730_v2, %v2101_v4  ;;  %v704_v20 = vrot.slane %v691_v19, %v2104_v5 }
 0x104   : > { %v2547_v0 = vadd.f32 %v604_v36, %v501_v22  ;;  %v2549_v14 = vadd.f32 %v643_v52, %v540_v28  ;;  %v560_v33 = vpop.permute.xlu0 %559  ;;  %v579_v1 = vsel %vm267_vm7, %v571_v40, 0.0  ;;  %v609_v26 = vmul.f32 %v594_v31, %v565_v29 }
 0x105   : > { %v648_v17 = vmul.f32 %v633_v38, %v565_v29  ;;  %v564_v11 = vsel %vm563_vm6, %v556_v16, %v560_v33  ;;  %v610_v46 = vmul.f32 %v598_v27, %v579_v1  ;;  %v649_v8 = vmul.f32 %v637_v62, %v579_v1 }
 0x106   : > { %v570_v63 = vsel %vm563_vm6, %v560_v33, %v548_v50  ;;  %v605_v37 = vmul.f32 %v594_v31, %v564_v11  ;;  %v2562_v22 = vadd.f32 %v609_v26, %v2486_v30  ;;  %v644_v51 = vmul.f32 %v633_v38, %v564_v11  ;;  %v661_v53 = vpop.permute.xlu1 %660  ;;  %v2620_v11 = vld [vmem:[#allocation6 + $0x40] sm:$0xf] }
 0x107   : > { %v2564_v28 = vadd.f32 %v648_v17, %v545_v49  ;;  %v575_v45 = vsel %vm267_vm7, %v570_v63, 0.0  ;;  %v618_v13 = vadd.f32 %v610_v46, %v2472_v39  ;;  %v2570_v55 = vadd.f32 %v649_v8, %v2475_v48  ;;  %v2584_v48 = vld [vmem:[#allocation6 + $0x1c] sm:$0xf] }
 0x108   : > { %v606_v56 = vmul.f32 %v598_v27, %v575_v45  ;;  %v2572_v50 = vadd.f32 %v605_v37, %v502_v42  ;;  %v659_v12 = vpop.permute.xlu0 %658  ;;  %v645_v30 = vmul.f32 %v637_v62, %v575_v45  ;;  %v2574_v18 = vadd.f32 %v644_v51, %v541_v43 }
 0x109   : > { %v1019_v16 = vrot.slane %v2584_v48, %v2098_v3  ;;  %v708_v23 = vrot.slane %v691_v19, %v2107_v6  ;;  %v743_v26 = vrot.slane %v730_v2, %v2104_v5  ;;  %v747_v17 = vrot.slane %v730_v2, %v2107_v6 }
 0x10a   : > { %v2577_v49 = vadd.f32 %v606_v56, %v2499_v9  ;;  %v2582_v59 = vadd.f32 %v645_v30, %v2502_v10  ;;  %v673_v39 = vpop.permute.xlu1 %672  ;;  %v1070_v37 = vrot.slane %v2620_v11, %v2107_v6  ;;  %v1023_v45 = vrot.slane %v2584_v48, %v2101_v4 }
 0x10b   : > { %v681_v42 = vsel %vm375_vm4, %v673_v39, %v661_v53 }
 0x10c   : > { %v671_v54 = vpop.permute.xlu0 %670  ;;  %v686_v43 = vsel %vm268_vm5, %v681_v42, 0.0  ;;  %v840_v42 = vld [vmem:[#allocation6 + $0x38] sm:$0xf] }
 0x10d   : > { %v680_v9 = vsel %vm375_vm4, %v671_v54, %v659_v12  ;;  %v717_v31 = vmul.f32 %v696_v57, %v686_v43  ;;  %v756_v10 = vmul.f32 %v735_v58, %v686_v43 }
 0x10e   : > { %v682_v35 = vsel %vm268_vm5, %v680_v9, 0.0  ;;  %v665_v32 = vpop.permute.xlu1 %664 }
 0x10f   : > { %v713_v27 = vmul.f32 %v696_v57, %v682_v35  ;;  %v752_v15 = vmul.f32 %v735_v58, %v682_v35  ;;  %v2600_v38 = vadd.f32 %v717_v31, %v2519_v24  ;;  %v2603_v36 = vadd.f32 %v756_v10, %v2522_v60 }
 0x110   : > { %v679_v52 = vsel %vm375_vm4, %v661_v53, %v665_v32  ;;  %v663_v62 = vpop.permute.xlu0 %662  ;;  %v1031_v24 = vrot.slane %v2584_v48, %v2107_v6 }
 0x111   : > { %v2609_v29 = vadd.f32 %v713_v27, %v2526_v41  ;;  %v2612_v40 = vadd.f32 %v752_v15, %v2528_v47  ;;  %v718_v33 = vmul.f32 %v700_v21, %v679_v52  ;;  %v757_v1 = vmul.f32 %v739_v61, %v679_v52 }
 0x112   : > { %v678_v60 = vsel %vm375_vm4, %v659_v12, %v663_v62  ;;  %v669_v63 = vpop.permute.xlu1 %668  ;;  %v845_v15 = vrot.slane %v840_v42, %v2098_v3 }
 0x113   : > { %v2623_v41 = vadd.f32 %v718_v33, %v2542_v44  ;;  %v2626_v47 = vadd.f32 %v757_v1, %v2545_v7  ;;  %v714_v46 = vmul.f32 %v700_v21, %v678_v60  ;;  %v753_v8 = vmul.f32 %v739_v61, %v678_v60 }
 0x114   : > { %v675_v51 = vsel %vm375_vm4, %v669_v63, %v673_v39  ;;  %v677_v53 = vsel %vm375_vm4, %v665_v32, %v669_v63  ;;  %v667_v44 = vpop.permute.xlu0 %666  ;;  %v801_v39 = vld [vmem:[#allocation6 + $0x14] sm:$0xf]  ;;  %v1062_v60 = vrot.slane %v2620_v11, %v2101_v4 }
 0x115   : > { %v2637_v19 = vadd.f32 %v714_v46, %v2547_v0  ;;  %v2640_v7 = vadd.f32 %v753_v8, %v2549_v14  ;;  %v719_v2 = vmul.f32 %v704_v20, %v677_v53  ;;  %v720_v56 = vmul.f32 %v708_v23, %v675_v51  ;;  %v3034_v32 = vld [vmem:[#allocation18_spill] sm:$0xff] }
 0x116   : > { %v758_v12 = vmul.f32 %v743_v26, %v677_v53  ;;  %v759_v30 = vmul.f32 %v747_v17, %v675_v51  ;;  %v674_v57 = vsel %vm375_vm4, %v667_v44, %v671_v54  ;;  %v676_v58 = vsel %vm375_vm4, %v663_v62, %v667_v44  ;;  %v771_v21 = vpop.permute.xlu1 %770  ;;  %v3039_v44 = vld [vmem:[#allocation16_spill] sm:$0xff] }
 0x117   : > { %v2647_v43 = vadd.f32 %v719_v2, %v2562_v22  ;;  %v2649_v0 = vadd.f32 %v720_v56, %v618_v13  ;;  %v715_v9 = vmul.f32 %v704_v20, %v676_v58  ;;  %v716_v14 = vmul.f32 %v708_v23, %v674_v57 }
 0x118   : > { %v2652_v61 = vadd.f32 %v758_v12, %v2564_v28  ;;  %v2655_v31 = vadd.f32 %v759_v30, %v2570_v55  ;;  %v754_v54 = vmul.f32 %v743_v26, %v676_v58  ;;  %v755_v10 = vmul.f32 %v747_v17, %v674_v57  ;;  %v769_v35 = vpop.permute.xlu0 %768  ;;  %v3035_v28 = vld [vmem:[#allocation19_spill] sm:$0xff] }
 0x119   : > { %v2658_v27 = vadd.f32 %v715_v9, %v2572_v50  ;;  %v2661_v22 = vadd.f32 %v716_v14, %v2577_v49  ;;  %v806_v13 = vrot.slane %v801_v39, %v2098_v3  ;;  %v2666_v20 = vmul.f32 %v1019_v16, %v3034_v32  ;;  %v3036_v50 = vld [vmem:[#allocation20_spill] sm:$0xff]  ;;  %v3037_v49 = vld [vmem:[#allocation15_spill] sm:$0xff] }
 0x11a   : > { %v2669_v52 = vmul.f32 %v1019_v16, %v3035_v28  ;;  %v2672_v55 = vadd.f32 %v754_v54, %v2574_v18  ;;  %v2675_v62 = vadd.f32 %v755_v10, %v2582_v59  ;;  %v2678_v23 = vmul.f32 %v1031_v24, %v3036_v50  ;;  %v775_v16 = vpop.permute.xlu1 %774  ;;  %v3038_v18 = vld [vmem:[#allocation21_spill] sm:$0xff] }
 0x11b   : > { %v2681_v33 = vmul.f32 %v1031_v24, %v3037_v49  ;;  %v2684_v1 = vmul.f32 %v1070_v37, %v3037_v49  ;;  %v2689_v26 = vmul.f32 %v1070_v37, %v3036_v50  ;;  %v2692_v17 = vmul.f32 %v1023_v45, %v3038_v18 }
 0x11c   : > { %v789_v59 = vsel %vm563_vm6, %v771_v21, %v775_v16  ;;  %v773_v46 = vpop.permute.xlu0 %772  ;;  %v810_v24 = vrot.slane %v801_v39, %v2101_v4  ;;  %v849_v53 = vrot.slane %v840_v42, %v2101_v4  ;;  %v2701_v2 = vmul.f32 %v1023_v45, %v3039_v44 }
 0x11d   : > { %v827_v8 = vmul.f32 %v806_v13, %v789_v59  ;;  %v866_v63 = vmul.f32 %v845_v15, %v789_v59  ;;  %v788_v51 = vsel %vm563_vm6, %v769_v35, %v773_v46  ;;  %v1027_v37 = vrot.slane %v2584_v48, %v2104_v5 }
 0x11e   : > { %v823_v56 = vmul.f32 %v806_v13, %v788_v51  ;;  %v862_v12 = vmul.f32 %v845_v15, %v788_v51  ;;  %v2706_v30 = vmul.f32 %v1062_v60, %v3038_v18  ;;  %v2709_v57 = vmul.f32 %v1062_v60, %v3039_v44  ;;  %v779_v14 = vpop.permute.xlu1 %778  ;;  %v3040_v18 = vld [vmem:[#allocation17_spill] sm:$0xff] }
 0x11f   : > { %v2712_v58 = vadd.f32 %v827_v8, %v2600_v38  ;;  %v2715_v9 = vadd.f32 %v866_v63, %v2603_v36  ;;  %v787_v54 = vsel %vm563_vm6, %v775_v16, %v779_v14  ;;  %v814_v13 = vrot.slane %v801_v39, %v2104_v5 }
 0x120   : > { %v2718_v45 = vadd.f32 %v823_v56, %v2609_v29  ;;  %v2721_v48 = vadd.f32 %v862_v12, %v2612_v40  ;;  %v777_v10 = vpop.permute.xlu0 %776  ;;  %v828_v15 = vmul.f32 %v810_v24, %v787_v54  ;;  %v867_v50 = vmul.f32 %v849_v53, %v787_v54 }
 0x121   : > { %v786_v38 = vsel %vm563_vm6, %v773_v46, %v777_v10  ;;  %v853_v36 = vrot.slane %v840_v42, %v2104_v5  ;;  %v818_v29 = vrot.slane %v801_v39, %v2107_v6  ;;  %v857_v40 = vrot.slane %v840_v42, %v2107_v6 }
 0x122   : > { %v824_v49 = vmul.f32 %v810_v24, %v786_v38  ;;  %v863_v60 = vmul.f32 %v849_v53, %v786_v38  ;;  %v2732_v59 = vmul.f32 %v1027_v37, %v3040_v18  ;;  %v2735_v16 = vadd.f32 %v828_v15, %v2623_v41  ;;  %v783_v63 = vpop.permute.xlu1 %782  ;;  %v936_v15 = vld [vmem:[#allocation6 + $0x18] sm:$0xf] }
 0x123   : > { %v2738_v8 = vadd.f32 %v867_v50, %v2626_v47  ;;  %v1058_v46 = vrot.slane %v2620_v11, %v2098_v3  ;;  %v785_v42 = vsel %vm563_vm6, %v779_v14, %v783_v63  ;;  %v791_v41 = vsel %vm563_vm6, %v783_v63, %v771_v21 }
 0x124   : > { %v2743_v24 = vadd.f32 %v824_v49, %v2637_v19  ;;  %v2746_v39 = vadd.f32 %v863_v60, %v2640_v7  ;;  %v781_v51 = vpop.permute.xlu0 %780  ;;  %v799_v47 = vsel %vm267_vm7, %v791_v41, 0.0  ;;  %v829_v53 = vmul.f32 %v814_v13, %v785_v42  ;;  %v975_v60 = vld [vmem:[#allocation6 + $0x3c] sm:$0xf] }
 0x125   : > { %v868_v44 = vmul.f32 %v853_v36, %v785_v42  ;;  %v784_v56 = vsel %vm563_vm6, %v777_v10, %v781_v51  ;;  %v830_v19 = vmul.f32 %v818_v29, %v799_v47  ;;  %v869_v12 = vmul.f32 %v857_v40, %v799_v47  ;;  %v3041_v42 = vld [vmem:[#allocation22_spill] sm:$0xff]  ;;  %v2787_v47 = vld [vmem:[#allocation6 + $0x20] sm:$0xf] }
 0x126   : > { %v790_v7 = vsel %vm563_vm6, %v781_v51, %v769_v35  ;;  %v825_v54 = vmul.f32 %v814_v13, %v784_v56  ;;  %v2759_v14 = vadd.f32 %v829_v53, %v2647_v43  ;;  %v864_v38 = vmul.f32 %v853_v36, %v784_v56  ;;  %v906_v49 = vpop.permute.xlu1 %905 }
 0x127   : > { %v2762_v21 = vadd.f32 %v868_v44, %v2652_v61  ;;  %v795_v50 = vsel %vm267_vm7, %v790_v7, 0.0  ;;  %v2767_v10 = vadd.f32 %v830_v19, %v2649_v0  ;;  %v2770_v63 = vadd.f32 %v869_v12, %v2655_v31  ;;  %v2801_v7 = vld [vmem:[#allocation6 + $0x44] sm:$0xf] }
 0x128   : > { %v826_v35 = vmul.f32 %v818_v29, %v795_v50  ;;  %v2773_v13 = vadd.f32 %v825_v54, %v2658_v27  ;;  %v904_v43 = vpop.permute.xlu0 %903  ;;  %v2776_v61 = vmul.f32 %v1027_v37, %v3041_v42  ;;  %v865_v41 = vmul.f32 %v857_v40, %v795_v50 }
 0x129   : > { %v2779_v51 = vadd.f32 %v864_v38, %v2672_v55  ;;  %v941_v36 = vrot.slane %v936_v15, %v2098_v3  ;;  %v980_v31 = vrot.slane %v975_v60, %v2098_v3  ;;  %v945_v29 = vrot.slane %v936_v15, %v2101_v4 }
 0x12a   : > { %v2783_v0 = vadd.f32 %v826_v35, %v2661_v22  ;;  %v1066_v27 = vrot.slane %v2620_v11, %v2104_v5  ;;  %v2792_v37 = vadd.f32 %v865_v41, %v2675_v62  ;;  %v918_v40 = vpop.permute.xlu1 %917  ;;  %v984_v55 = vrot.slane %v975_v60, %v2101_v4 }
 0x12b   : > { %v949_v53 = vrot.slane %v936_v15, %v2104_v5  ;;  %v953_v22 = vrot.slane %v936_v15, %v2107_v6  ;;  %v926_v44 = vsel %vm375_vm4, %v918_v40, %v906_v49  ;;  %v988_v19 = vrot.slane %v975_v60, %v2104_v5 }
 0x12c   : > { %v916_v56 = vpop.permute.xlu0 %915  ;;  %v992_v12 = vrot.slane %v975_v60, %v2107_v6  ;;  %v1075_v11 = vmul.f32 %v1058_v46, %v3035_v28  ;;  %v931_v62 = vsel %vm268_vm5, %v926_v44, 0.0  ;;  %v2810_v15 = vrot.slane %v2787_v47, %v2098_v3 }
 0x12d   : > { %v925_v54 = vsel %vm375_vm4, %v916_v56, %v904_v43  ;;  %v1079_v50 = vmul.f32 %v1058_v46, %v3034_v32  ;;  %v962_v38 = vmul.f32 %v941_v36, %v931_v62  ;;  %v1001_v35 = vmul.f32 %v980_v31, %v931_v62 }
 0x12e   : > { %v927_v60 = vsel %vm268_vm5, %v925_v54, 0.0  ;;  %v2816_v41 = vmul.f32 %v1066_v27, %v3040_v18  ;;  %v910_v44 = vpop.permute.xlu1 %909  ;;  %v2820_v6 = vrot.slane %v2801_v7, %v2098_v3  ;;  %v2823_v5 = vmul.f32 %v1066_v27, %v3041_v42 }
 0x12f   : > { %v958_v28 = vmul.f32 %v941_v36, %v927_v60  ;;  %v997_v34 = vmul.f32 %v980_v31, %v927_v60  ;;  %v970_v32 = vadd.f32 %v962_v38, %v2712_v58  ;;  %v1009_v46 = vadd.f32 %v1001_v35, %v2715_v9 }
 0x130   : > { %v924_v62 = vsel %vm375_vm4, %v906_v49, %v910_v44  ;;  %v908_v54 = vpop.permute.xlu0 %907  ;;  %v2831_v18 = vrot.slane %v2787_v47, %v2101_v4  ;;  %v2840_v9 = vrot.slane %v2801_v7, %v2101_v4 }
 0x131   : > { %v966_v36 = vadd.f32 %v958_v28, %v2718_v45  ;;  %v1005_v3 = vadd.f32 %v997_v34, %v2721_v48  ;;  %v963_v31 = vmul.f32 %v945_v29, %v924_v62  ;;  %v1002_v60 = vmul.f32 %v984_v55, %v924_v62 }
 0x132   : > { %v923_v42 = vsel %vm375_vm4, %v904_v43, %v908_v54  ;;  %v1048_v58 = vadd.f32 %v2666_v20, %v970_v32  ;;  %v1087_v49 = vadd.f32 %v1079_v50, %v1009_v46  ;;  %v914_v28 = vpop.permute.xlu1 %913 }
 0x133   : > { %v971_v27 = vadd.f32 %v963_v31, %v2735_v16  ;;  %v1010_v38 = vadd.f32 %v1002_v60, %v2738_v8  ;;  %v959_v35 = vmul.f32 %v945_v29, %v923_v42  ;;  %v998_v45 = vmul.f32 %v984_v55, %v923_v42 }
 0x134   : > { %v920_v34 = vsel %vm375_vm4, %v914_v28, %v918_v40  ;;  %v922_v48 = vsel %vm375_vm4, %v910_v44, %v914_v28  ;;  %v912_v43 = vpop.permute.xlu0 %911  ;;  %v1044_v20 = vadd.f32 %v2669_v52, %v966_v36  ;;  %v1083_v32 = vadd.f32 %v1075_v11, %v1005_v3 }
 0x135   : > { %v967_v4 = vadd.f32 %v959_v35, %v2743_v24  ;;  %v1006_v50 = vadd.f32 %v998_v45, %v2746_v39  ;;  %v964_v16 = vmul.f32 %v949_v53, %v922_v48  ;;  %v965_v46 = vmul.f32 %v953_v22, %v920_v34  ;;  %v3042_v35 = vld [vmem:[#allocation13_spill] sm:$0xff]  ;;  %v3043_v45 = vld [vmem:[#allocation14_spill] sm:$0xff] }
 0x136   : > { %v1003_v8 = vmul.f32 %v988_v19, %v922_v48  ;;  %v1004_v29 = vmul.f32 %v992_v12, %v920_v34  ;;  %v919_v55 = vsel %vm375_vm4, %v912_v43, %v916_v56  ;;  %v921_v40 = vsel %vm375_vm4, %v908_v54, %v912_v43  ;;  %v1094_v36 = vpop.permute.xlu1 %1093 }
 0x137   : > { %v972_v44 = vadd.f32 %v964_v16, %v2759_v14  ;;  %v973_v62 = vadd.f32 %v965_v46, %v2767_v10  ;;  %v960_v52 = vmul.f32 %v949_v53, %v921_v40  ;;  %v961_v11 = vmul.f32 %v953_v22, %v919_v55 }
 0x138   : > { %v1011_v24 = vadd.f32 %v1003_v8, %v2762_v21  ;;  %v1012_v39 = vadd.f32 %v1004_v29, %v2770_v63  ;;  %v999_v3 = vmul.f32 %v988_v19, %v921_v40  ;;  %v1000_v31 = vmul.f32 %v992_v12, %v919_v55  ;;  %v1092_v60 = vpop.permute.xlu0 %1091 }
 0x139   : > { %v2860_v42 = vadd.f32 %v2678_v23, %v973_v62  ;;  %v968_v56 = vadd.f32 %v960_v52, %v2773_v13  ;;  %v969_v54 = vadd.f32 %v961_v11, %v2783_v0  ;;  %v1049_v14 = vadd.f32 %v2692_v17, %v971_v27 }
 0x13a   : > { %v1090_v10 = vadd.f32 %v2689_v26, %v1012_v39  ;;  %v1007_v53 = vadd.f32 %v999_v3, %v2779_v51  ;;  %v1008_v21 = vadd.f32 %v1000_v31, %v2792_v37  ;;  %v1088_v63 = vadd.f32 %v2706_v30, %v1010_v38  ;;  %v1098_v19 = vpop.permute.xlu1 %1097 }
 0x13b   : > { %v2870_v22 = vadd.f32 %v2681_v33, %v969_v54  ;;  %v1045_v23 = vadd.f32 %v2701_v2, %v967_v4  ;;  %v1084_v13 = vadd.f32 %v2709_v57, %v1006_v50  ;;  %v1050_v0 = vadd.f32 %v2776_v61, %v972_v44 }
 0x13c   : > { %v1086_v17 = vadd.f32 %v2684_v1, %v1008_v21  ;;  %v1112_v26 = vsel %vm563_vm6, %v1094_v36, %v1098_v19  ;;  %v1096_v51 = vpop.permute.xlu0 %1095  ;;  %v1046_v37 = vadd.f32 %v2732_v59, %v968_v56  ;;  %v1085_v30 = vadd.f32 %v2816_v41, %v1007_v53 }
 0x13d   : > { %v1150_v33 = vmul.f32 %v2810_v15, %v1112_v26  ;;  %v1189_v12 = vmul.f32 %v2820_v6, %v1112_v26  ;;  %v1111_v2 = vsel %vm563_vm6, %v1092_v60, %v1096_v51  ;;  %v1089_v57 = vadd.f32 %v2823_v5, %v1011_v24 }
 0x13e   : > { %v1146_v61 = vmul.f32 %v2810_v15, %v1111_v2  ;;  %v1185_v1 = vmul.f32 %v2820_v6, %v1111_v2  ;;  %v1102_v38 = vpop.permute.xlu1 %1101  ;;  %v1137_v59 = vrot.slane %v2787_v47, %v3042_v35  ;;  %v1141_v41 = vrot.slane %v2787_v47, %v3043_v45 }
 0x13f   : > { %v1158_v27 = vadd.f32 %v1150_v33, %v1048_v58  ;;  %v1197_v28 = vadd.f32 %v1189_v12, %v1087_v49  ;;  %v1110_v48 = vsel %vm563_vm6, %v1098_v19, %v1102_v38  ;;  %v1176_v5 = vrot.slane %v2801_v7, %v3042_v35 }
 0x140   : > { %v1154_v34 = vadd.f32 %v1146_v61, %v1044_v20  ;;  %v1100_v43 = vpop.permute.xlu0 %1099  ;;  %v1193_v15 = vadd.f32 %v1185_v1, %v1083_v32  ;;  %v1151_v6 = vmul.f32 %v2831_v18, %v1110_v48  ;;  %v1190_v58 = vmul.f32 %v2840_v9, %v1110_v48 }
 0x141   : > { %v1109_v4 = vsel %vm563_vm6, %v1096_v51, %v1100_v43  ;;  %v1180_v47 = vrot.slane %v2801_v7, %v3043_v45 }
 0x142   : > { %v1147_v49 = vmul.f32 %v2831_v18, %v1109_v4  ;;  %v1186_v20 = vmul.f32 %v2840_v9, %v1109_v4  ;;  %v1209_v50 = vpack.c.bf16 %v1197_v28, %v1193_v15  ;;  %v1201_v16 = vpack.c.bf16 %v1158_v27, %v1154_v34  ;;  %v1106_v29 = vpop.permute.xlu1 %1105 }
 0x143   : > { %v1159_v46 = vadd.f32 %v1151_v6, %v1049_v14  ;;  %v1198_v8 = vadd.f32 %v1190_v58, %v1088_v63  ;;  %v1108_v40 = vsel %vm563_vm6, %v1102_v38, %v1106_v29  ;;  %v1114_v44 = vsel %vm563_vm6, %v1106_v29, %v1094_v36 }
 0x144   : > { %v1155_v32 = vadd.f32 %v1147_v49, %v1045_v23  ;;  %v1194_v55 = vadd.f32 %v1186_v20, %v1084_v13  ;;  %v1104_v62 = vpop.permute.xlu0 %1103  ;;  %1385 = vmatprep.mubr.bf16.mxu0 %v1209_v50  ;;  %v1122_v18 = vsel %vm267_vm7, %v1114_v44, 0.0  ;;  %v1152_v52 = vmul.f32 %v1137_v59, %v1108_v40 }
 0x145   : > { %v1191_v9 = vmul.f32 %v1176_v5, %v1108_v40  ;;  %v1107_v11 = vsel %vm563_vm6, %v1100_v43, %v1104_v62  ;;  %1386 = vmatmul.mubr.bf16.vlgmr.msra.gmra.mrb[0].mxu0 %v1201_v16  ;;  %v1153_v24 = vmul.f32 %v1141_v41, %v1122_v18  ;;  %v1192_v39 = vmul.f32 %v1180_v47, %v1122_v18 }
 0x146   : > { %v1113_v3 = vsel %vm563_vm6, %v1104_v62, %v1092_v60  ;;  %v1148_v31 = vmul.f32 %v1137_v59, %v1107_v11  ;;  %v1160_v56 = vadd.f32 %v1152_v52, %v1050_v0  ;;  %v1187_v54 = vmul.f32 %v1176_v5, %v1107_v11 }
 0x147   : > { %v1118_v36 = vsel %vm267_vm7, %v1113_v3, 0.0  ;;  %v1210_v14 = vpack.c.bf16 %v1198_v8, %v1194_v55  ;;  %v1161_v53 = vadd.f32 %v1153_v24, %v2860_v42  ;;  %v1200_v21 = vadd.f32 %v1192_v39, %v1090_v10 }
 0x148   : > { %v1149_v63 = vmul.f32 %v1141_v41, %v1118_v36  ;;  %v1156_v19 = vadd.f32 %v1148_v31, %v1046_v37  ;;  %v1188_v23 = vmul.f32 %v1180_v47, %v1118_v36  ;;  %v1195_v13 = vadd.f32 %v1187_v54, %v1085_v30 }
 0x149   : > { %1393 = vmatprep.mubr.bf16.mxu0 %v1210_v14  ;;  %v1199_v26 = vadd.f32 %v1191_v9, %v1089_v57  ;;  %v1202_v51 = vpack.c.bf16 %v1159_v46, %v1155_v32 }
 0x14a   : > { %v1157_v25 = vadd.f32 %v1149_v63, %v2870_v22  ;;  %v1203_v60 = vpack.c.bf16 %v1160_v56, %v1156_v19  ;;  %v1196_v0 = vadd.f32 %v1188_v23, %v1086_v17 }
 0x14b   : > { %v1211_v33 = vpack.c.bf16 %v1199_v26, %v1195_v13 }
 0x14c   : > { %v1204_v12 = vpack.c.bf16 %v1161_v53, %v1157_v25  ;;  %v1212_v2 = vpack.c.bf16 %v1200_v21, %v1196_v0 }
 0x14d   : > { %1401 = vmatprep.mubr.bf16.mxu1 %v1211_v33  ;;  %1394 = vmatmul.mubr.bf16.gmra.mrb[4].mxu0 %v1202_v51 }
 0x14e   : > { %1402 = vmatmul.mubr.bf16.vlgmr.msra.gmra.mrb[0].mxu1 %v1203_v60 }
 0x14f   : > { %1409 = vmatprep.mubr.bf16.mxu1 %v1212_v2 }
 0x156   : > { %1410 = vmatmul.mubr.bf16.gmra.mrb[4].mxu1 %v1204_v12 }
 0x218   : > { %v1584_v42 = vpop.f32.mrb[0].mxu0 }
 0x219   : > { %v1585_v10 = vpop.f32.mrb[1].mxu0 }
 0x21a   : > { %v1586_v37 = vadd.f32 %v1585_v10, %v1584_v42  ;;  %v1587_v61 = vpop.f32.mrb[2].mxu0 }
 0x21b   : > { %v1588_v30 = vpop.f32.mrb[3].mxu0 }
 0x21c   : > { %1418 = vst [vmem:[%s2919_s17] sm:$0xff] %v1586_v37  ;;  %v1589_v22 = vadd.f32 %v1588_v30, %v1587_v61 }
 0x21e   : > { %1419 = vst [vmem:[%s2919_s17 + $0x8] sm:$0xff] %v1589_v22 }
 0x220   : > { %v1590_v17 = vpop.f32.mrb[4].mxu0 }
 0x221   : > { %v1596_v57 = vpop.f32.mrb[0].mxu1  ;;  %v1591_v1 = vpop.f32.mrb[5].mxu0 }
 0x222   : > { %v1592_v27 = vadd.f32 %v1591_v1, %v1590_v17  ;;  %v1597_v38 = vpop.f32.mrb[1].mxu1  ;;  %v1593_v35 = vpop.f32.mrb[6].mxu0 }
 0x223   : > { %v1598_v59 = vadd.f32 %v1597_v38, %v1596_v57  ;;  %v1599_v45 = vpop.f32.mrb[2].mxu1  ;;  %v1594_v41 = vpop.f32.mrb[7].mxu0 }
 0x224   : > { %1420 = vst [vmem:[%s2919_s17 + $0x10] sm:$0xff] %v1592_v27  ;;  %v1595_v28 = vadd.f32 %v1594_v41, %v1593_v35  ;;  %v1600_v34 = vpop.f32.mrb[3].mxu1 }
 0x225   : > { %1422 = vst [vmem:[%s2919_s17 + $0x20] sm:$0xff] %v1598_v59  ;;  %v1601_v48 = vadd.f32 %v1600_v34, %v1599_v45 }
 0x226   : > { %1421 = vst [vmem:[%s2919_s17 + $0x18] sm:$0xff] %v1595_v28 }
 0x227   : > { %1423 = vst [vmem:[%s2919_s17 + $0x28] sm:$0xff] %v1601_v48 }
 0x229   : > { %v1602_v43 = vpop.f32.mrb[4].mxu1 }
 0x22a   : > { %v1603_v5 = vpop.f32.mrb[5].mxu1 }
 0x22b   : > { %v1604_v15 = vadd.f32 %v1603_v5, %v1602_v43  ;;  %v1605_v6 = vpop.f32.mrb[6].mxu1 }
 0x22c   : > { %v1606_v58 = vpop.f32.mrb[7].mxu1 }
 0x22d   : > { %1424 = vst [vmem:[%s2919_s17 + $0x30] sm:$0xff] %v1604_v15  ;;  %v1607_v4 = vadd.f32 %v1606_v58, %v1605_v6 }
 0x22f   : > { %1425 = vst [vmem:[%s2919_s17 + $0x38] sm:$0xff] %v1607_v4 }
 0x230   : > { %1814 = shalt.err (!%p1811_p2)
}
 0x231   : > { %s1815_s8 = scalar_lea.hbm %s2934_s5, 1024  ;;  %s1819_s29 = scalar_lea.hbm %s2983_s3, 2048 }
 0x232   : > { %p1816_p13 = scmp.ne.s32.totalorder %s2934_s5, %s1815_s8  ;;  %p1820_p4 = scmp.lt.u32.totalorder %s2934_s5, %s2983_s3 }
 0x233   : > { %p1821_p5 = scmp.lt.u32.totalorder %s1819_s29, %s1815_s8  ;;  %p1823_p11 = scmp.lt.u32.totalorder %s1815_s8, %s2934_s5 }
 0x234   : > { %p1817_p6 = pnand %p1816_p13, %p3045_p0 }
 0x235   : > { %p1822_p8 = por %p1821_p5, %p1820_p4 }
 0x236   : > { %p1818_p10 = pneg %p1817_p6 }
 0x237   : > { %p1824_p1 = por %p1823_p11, %p1822_p8 }
 0x239   : > { %p1825_p3 = pnand %p1824_p1, %p1818_p10 }
 0x23b   : > { %1828 = shalt.err (!%p1825_p3)
}
 0x23c   : > { %s1883_s20 = smov 128   ;;  %s1884_s17 = smov 8  }
 0x23d   : > { %1634 = dma.vmem_to_hbm [thread:$0]  (%p3045_p0), %s2929_s24, 1024, %s2934_s5, %s1427_s10, %s1883_s20, %s1883_s20, %s1884_s17  }
 0x23e PF: > { %s1455_s26 = sand.u32 1, %s1859_s12   ;;  %p3046_p7 = scmp.ne.s32.totalorder %s3010_s19, 0 }
 0x23f   : > { %p3047_p9 = scmp.ge.s32.totalorder %s1871_s15, 2  ;;  %s1456_s27 = scalar_lea.sflag [#allocation5], %s1455_s26 }
 0x241   : > { %p1648_p12 = pnand %p3047_p9, %p3046_p7 }
 0x243   : > { %1854 = dma.done.wait (!%p1648_p12), %s1456_s27, 1024  }
 0x244   : > { %1856 = vsyncadd (!%p1648_p12), %s1456_s27, 4294966272  ;;  %p17_p2 = scmp.ge.s32.totalorder %s2015_s4, 4   ;;  %s3048_s12 = smov %s1863_s13 }
 0x245   : > { %s3049_s13 = smov %s1867_s14  ;;  %s3050_s14 = smov %s2031_s9 }
 0x246   : > { %s3051_s15 = smov %s2015_s4  ;;  %19 = sbr.rel (!%p17_p2) target bundleno = 6 (0x6), region = 102 }
 0x24d   :  { %1461 = vsyncpa [#allocation4], 1 }
 0x24e   :  { %1463 = vsyncpa [#allocation4 + $0x1], 1 }
 0x24f   :  { %1464 = vsyncpa [#allocation7], 1 }
 0x250   :  { %1465 = vsyncpa [#allocation5], 1 }
 0x251   :  { %1467 = vsyncpa [#allocation5 + $0x1], 1 }

</bundles_post_ra>
